<compile_context>
chip_gen: v7x
topology: tpu7x:2x2x1
jax: 0.10.0
libtpu: 0.0.40
codegen_flags: <defaults>
</compile_context>

<pallas_src>
import jax
import jax.numpy as jnp
from jax import lax
from jax.experimental import pallas as pl
from jax.experimental.pallas import tpu as pltpu

# ---- model hyper-parameters (small, consistent with the module signature) ----
DIM      = 32     # dim
DEPTH    = 2      # depth
HEADS    = 4      # heads
DIM_HEAD = 16     # dim_head
INNER    = HEADS * DIM_HEAD   # 64  (project_out = True since heads != 1)
MLP_DIM  = 64     # mlp_dim (hidden_dim of FeedForward)
EPS      = 1e-5   # nn.LayerNorm default eps
SCALE    = DIM_HEAD ** -0.5


def _gelu_exact(x):
    # nn.GELU() default = exact erf formulation
    return 0.5 * x * (1.0 + lax.erf(x * (1.0 / jnp.sqrt(2.0).astype(x.dtype))))


def _layernorm(x, w, b):
    mu  = jnp.mean(x, axis=-1, keepdims=True)
    var = jnp.mean(jnp.square(x - mu), axis=-1, keepdims=True)
    return (x - mu) * lax.rsqrt(var + EPS) * w + b


def transformer_kernel(x_ref,
                       ln1w_ref, ln1b_ref, wqkv_ref, wo_ref, bo_ref,
                       ln2w_ref, ln2b_ref, w1_ref, b1_ref, w2_ref, b2_ref,
                       o_ref, attn_ref):
    """All DEPTH transformer layers for ONE sequence tile (grid axis = batch)."""
    x = x_ref[...]                                                 # (N, D) f32

    for l in range(DEPTH):                                         # static unroll (DEPTH tiny)
        # ---------------- PreNorm + multi-head attention + residual ----------------
        xn  = _layernorm(x, ln1w_ref[l], ln1b_ref[l])              # (N, D)
        qkv = jnp.dot(xn, wqkv_ref[l],
                      preferred_element_type=jnp.float32)          # (N, 3*INNER)

        for h in range(HEADS):
            cs0 = h * DIM_HEAD
            qh = qkv[:, cs0:cs0 + DIM_HEAD]                        # (N, Dh)
            kh = qkv[:, INNER + cs0:INNER + cs0 + DIM_HEAD]
            vh = qkv[:, 2 * INNER + cs0:2 * INNER + cs0 + DIM_HEAD]
            # contract last dims directly: no kh.T (no XLU transpose)
            dots = lax.dot_general(
                qh, kh, (((1,), (1,)), ((), ())),
                preferred_element_type=jnp.float32) * SCALE        # (N, N)
            dots = dots - jnp.max(dots, axis=-1, keepdims=True)
            e = jnp.exp(dots)
            inv = pl.reciprocal(jnp.sum(e, axis=-1, keepdims=True), approx=True)
            oh = jnp.dot(e * inv, vh,
                         preferred_element_type=jnp.float32)       # (N, Dh)
            # stage the head output in VMEM scratch instead of accumulating through
            # per-head out-projection slices (one slab matmul below instead of H tiny ones)
            attn_ref[:, cs0:cs0 + DIM_HEAD] = oh

        attn_out = jnp.dot(attn_ref[...], wo_ref[l],
                           preferred_element_type=jnp.float32) + bo_ref[l]   # (N, D)
        x = x + attn_out                                           # residual 1

        # -------- PreNorm + FeedForward (Linear -> GELU -> Linear) + residual --------
        # dropout p=0.0 => identity, elided
        xn2 = _layernorm(x, ln2w_ref[l], ln2b_ref[l])
        h1  = jnp.dot(xn2, w1_ref[l], preferred_element_type=jnp.float32) + b1_ref[l]
        h1  = _gelu_exact(h1)
        ff  = jnp.dot(h1, w2_ref[l], preferred_element_type=jnp.float32) + b2_ref[l]
        x = x + ff                                                 # residual 2

    o_ref[...] = x.astype(o_ref.dtype)


def _resident_spec(arr):
    """Full-array block with a constant index_map -> DMA'd once, VMEM-resident across grid."""
    nd = arr.ndim
    return pl.BlockSpec(arr.shape, lambda b, _nd=nd: (0,) * _nd)


def binformer_transformer(x, params):
    """Run all DEPTH layers with a batch grid; weights stay resident, per-B tiles stream."""
    B, N, D = x.shape
    x2d = x.reshape(B * N, D)                      # fold B,N; grid blocks are one sequence

    in_specs = [pl.BlockSpec((N, D), lambda b: (b, 0))]
    in_specs += [_resident_spec(p) for p in params]
    out_specs = pl.BlockSpec((N, D), lambda b: (b, 0))

    # Advisory cost estimate for XLA's scheduler (this call is tiny / overhead-bound).
    flops = B * DEPTH * (
        2 * N * DIM * 3 * INNER                      # QKV projection
        + HEADS * 2 * (2 * N * N * DIM_HEAD)         # scores + attn@V
        + 2 * N * INNER * DIM                        # out-projection
        + 2 * N * DIM * MLP_DIM + 2 * N * MLP_DIM * DIM)   # FeedForward
    transcendentals = B * DEPTH * (HEADS * N * N + N * MLP_DIM + 2 * N)
    bytes_accessed = (2 * x2d.size * x2d.dtype.itemsize
                      + sum(int(p.size) * p.dtype.itemsize for p in params))

    out2d = pl.pallas_call(
        transformer_kernel,
        out_shape=jax.ShapeDtypeStruct((B * N, D), x.dtype),
        grid_spec=pltpu.PrefetchScalarGridSpec(
            num_scalar_prefetch=0,
            grid=(B,),
            in_specs=in_specs,
            out_specs=out_specs,
            scratch_shapes=[pltpu.VMEM((N, INNER), jnp.float32)],   # attention head slab
        ),
        compiler_params=pltpu.CompilerParams(
            dimension_semantics=("parallel",),       # batch axis: megacore-shardable on v7x
            vmem_limit_bytes=32 * 1024 * 1024,       # explicit (v5e scoped default is 16 MiB)
        ),
        cost_estimate=pl.CostEstimate(flops=int(flops),
                                      transcendentals=int(transcendentals),
                                      bytes_accessed=int(bytes_accessed)),
    )(x2d, *params)
    return out2d.reshape(B, N, D)


def init_params(key):
    """Deterministic synthetic parameters, stacked over DEPTH.

    Weights are stored (in_features, out_features) so the kernel does x @ W
    (equivalent to PyTorch's x @ W_pt.T). Per-layer vectors are stored
    (DEPTH, 1, d) so each layer's slice is a 2-D (1, d) broadcastable row.
    """
    ks = jax.random.split(key, 6)
    s = 0.02
    ln1_w = jnp.ones((DEPTH, 1, DIM), jnp.float32)
    ln1_b = jnp.zeros((DEPTH, 1, DIM), jnp.float32)
    w_qkv = s * jax.random.normal(ks[0], (DEPTH, DIM, 3 * INNER), jnp.float32)
    w_o   = s * jax.random.normal(ks[1], (DEPTH, INNER, DIM), jnp.float32)
    b_o   = s * jax.random.normal(ks[2], (DEPTH, 1, DIM), jnp.float32)
    ln2_w = jnp.ones((DEPTH, 1, DIM), jnp.float32)
    ln2_b = jnp.zeros((DEPTH, 1, DIM), jnp.float32)
    w1    = s * jax.random.normal(ks[3], (DEPTH, DIM, MLP_DIM), jnp.float32)
    b1    = s * jax.random.normal(ks[4], (DEPTH, 1, MLP_DIM), jnp.float32)
    w2    = s * jax.random.normal(ks[5], (DEPTH, MLP_DIM, DIM), jnp.float32)
    b2    = jnp.zeros((DEPTH, 1, DIM), jnp.float32)
    return (ln1_w, ln1_b, w_qkv, w_o, b_o, ln2_w, ln2_b, w1, b1, w2, b2)


# ---------------- pure-JAX reference (for correctness check) ----------------
def _layernorm_ref(x, w, b):
    mu = jnp.mean(x, axis=-1, keepdims=True)
    var = jnp.mean(jnp.square(x - mu), axis=-1, keepdims=True)
    return (x - mu) * lax.rsqrt(var + EPS) * w + b


def transformer_ref(x, params):
    (ln1w, ln1b, wqkv, wo, bo, ln2w, ln2b, w1, b1, w2, b2) = params
    B, N, _ = x.shape
    for l in range(DEPTH):
        xn = _layernorm_ref(x, ln1w[l], ln1b[l])
        qkv = xn @ wqkv[l]
        q, k, v = jnp.split(qkv, 3, axis=-1)
        q = q.reshape(B, N, HEADS, DIM_HEAD).transpose(0, 2, 1, 3)
        k = k.reshape(B, N, HEADS, DIM_HEAD).transpose(0, 2, 1, 3)
        v = v.reshape(B, N, HEADS, DIM_HEAD).transpose(0, 2, 1, 3)
        dots = jnp.einsum('bhnd,bhmd->bhnm', q, k) * SCALE
        attn = jax.nn.softmax(dots, axis=-1)
        out = jnp.einsum('bhnm,bhmd->bhnd', attn, v)
        out = out.transpose(0, 2, 1, 3).reshape(B, N, INNER)
        x = x + (out @ wo[l] + bo[l])
        xn2 = _layernorm_ref(x, ln2w[l], ln2b[l])
        h1 = jax.nn.gelu(xn2 @ w1[l] + b1[l], approximate=False)
        x = x + (h1 @ w2[l] + b2[l])
    return x


if __name__ == "__main__":
    key = jax.random.PRNGKey(0)
    kx, kp = jax.random.split(key)

    B, N = 2, 8
    x = jax.random.normal(kx, (B, N, DIM), jnp.float32)
    params = init_params(kp)

    y = jax.block_until_ready(binformer_transformer(x, params))
    y_ref = transformer_ref(x, params)

    assert y.shape == (B, N, DIM)
    max_err = jnp.max(jnp.abs(y - y_ref))
    # tolerance leaves headroom for the EUP approximate reciprocal in the softmax;
    # still tight enough to catch real bugs.
    assert jnp.allclose(y, y_ref, atol=5e-4, rtol=5e-4), f"max abs err {max_err}"

    print("KERNEL_OK")
</pallas_src>

<mosaic_0001>
module attributes {stable_mosaic.version = 11 : i64} {
  func.func @transformer_kernel(%arg0: i32, %arg1: memref<8x32xf32, #tpu.memory_space<vmem>>, %arg2: memref<2x1x32xf32, #tpu.memory_space<vmem>>, %arg3: memref<2x1x32xf32, #tpu.memory_space<vmem>>, %arg4: memref<2x32x192xf32, #tpu.memory_space<vmem>>, %arg5: memref<2x64x32xf32, #tpu.memory_space<vmem>>, %arg6: memref<2x1x32xf32, #tpu.memory_space<vmem>>, %arg7: memref<2x1x32xf32, #tpu.memory_space<vmem>>, %arg8: memref<2x1x32xf32, #tpu.memory_space<vmem>>, %arg9: memref<2x32x64xf32, #tpu.memory_space<vmem>>, %arg10: memref<2x1x64xf32, #tpu.memory_space<vmem>>, %arg11: memref<2x64x32xf32, #tpu.memory_space<vmem>>, %arg12: memref<2x1x32xf32, #tpu.memory_space<vmem>>, %arg13: memref<8x32xf32, #tpu.memory_space<vmem>>, %arg14: memref<8x64xf32, #tpu.memory_space<vmem>>) attributes {dimension_semantics = [#tpu.dimension_semantics<parallel>], iteration_bounds = array<i64: 2>, scalar_prefetch = 0 : i64, scratch_operands = 1 : i64, tpu.core_type = #tpu.core_type<tc>, window_params = [{transform_indices = @transform_0, window_bounds = array<i64: 8, 32>}, {pipeline_mode = #tpu.pipeline_mode<synchronous>, transform_indices = @transform_1, window_bounds = array<i64: 2, 1, 32>}, {pipeline_mode = #tpu.pipeline_mode<synchronous>, transform_indices = @transform_2, window_bounds = array<i64: 2, 1, 32>}, {pipeline_mode = #tpu.pipeline_mode<synchronous>, transform_indices = @transform_3, window_bounds = array<i64: 2, 32, 192>}, {pipeline_mode = #tpu.pipeline_mode<synchronous>, transform_indices = @transform_4, window_bounds = array<i64: 2, 64, 32>}, {pipeline_mode = #tpu.pipeline_mode<synchronous>, transform_indices = @transform_5, window_bounds = array<i64: 2, 1, 32>}, {pipeline_mode = #tpu.pipeline_mode<synchronous>, transform_indices = @transform_6, window_bounds = array<i64: 2, 1, 32>}, {pipeline_mode = #tpu.pipeline_mode<synchronous>, transform_indices = @transform_7, window_bounds = array<i64: 2, 1, 32>}, {pipeline_mode = #tpu.pipeline_mode<synchronous>, transform_indices = @transform_8, window_bounds = array<i64: 2, 32, 64>}, {pipeline_mode = #tpu.pipeline_mode<synchronous>, transform_indices = @transform_9, window_bounds = array<i64: 2, 1, 64>}, {pipeline_mode = #tpu.pipeline_mode<synchronous>, transform_indices = @transform_10, window_bounds = array<i64: 2, 64, 32>}, {pipeline_mode = #tpu.pipeline_mode<synchronous>, transform_indices = @transform_11, window_bounds = array<i64: 2, 1, 32>}, {transform_indices = @transform_12, window_bounds = array<i64: 8, 32>}]} {
    %c0 = arith.constant 0 : index
    %c0_0 = arith.constant 0 : index
    %0 = vector.load %arg1[%c0, %c0_0] : memref<8x32xf32, #tpu.memory_space<vmem>>, vector<8x32xf32>
    %c0_1 = arith.constant 0 : index
    %c0_2 = arith.constant 0 : index
    %c0_3 = arith.constant 0 : index
    %1 = vector.load %arg2[%c0_1, %c0_2, %c0_3] : memref<2x1x32xf32, #tpu.memory_space<vmem>>, vector<1x1x32xf32>
    %2 = vector.shape_cast %1 : vector<1x1x32xf32> to vector<1x32xf32>
    %c0_4 = arith.constant 0 : index
    %c0_5 = arith.constant 0 : index
    %c0_6 = arith.constant 0 : index
    %3 = vector.load %arg3[%c0_4, %c0_5, %c0_6] : memref<2x1x32xf32, #tpu.memory_space<vmem>>, vector<1x1x32xf32>
    %4 = vector.shape_cast %3 : vector<1x1x32xf32> to vector<1x32xf32>
    %cst = arith.constant dense<0.000000e+00> : vector<8xf32>
    %5 = vector.multi_reduction <add>, %0, %cst [1] : vector<8x32xf32> to vector<8xf32>
    %6 = vector.shape_cast %5 : vector<8xf32> to vector<8x1xf32>
    %cst_7 = arith.constant 3.200000e+01 : f32
    %7 = vector.broadcast %cst_7 : f32 to vector<8x1xf32>
    %8 = arith.divf %6, %7 : vector<8x1xf32>
    %9 = vector.broadcast %8 : vector<8x1xf32> to vector<8x32xf32>
    %10 = arith.subf %0, %9 : vector<8x32xf32>
    %11 = arith.mulf %10, %10 : vector<8x32xf32>
    %cst_8 = arith.constant dense<0.000000e+00> : vector<8xf32>
    %12 = vector.multi_reduction <add>, %11, %cst_8 [1] : vector<8x32xf32> to vector<8xf32>
    %13 = vector.shape_cast %12 : vector<8xf32> to vector<8x1xf32>
    %cst_9 = arith.constant 3.200000e+01 : f32
    %14 = vector.broadcast %cst_9 : f32 to vector<8x1xf32>
    %15 = arith.divf %13, %14 : vector<8x1xf32>
    %16 = vector.broadcast %8 : vector<8x1xf32> to vector<8x32xf32>
    %17 = arith.subf %0, %16 : vector<8x32xf32>
    %cst_10 = arith.constant 9.99999974E-6 : f32
    %18 = vector.broadcast %cst_10 : f32 to vector<8x1xf32>
    %19 = arith.addf %15, %18 : vector<8x1xf32>
    %20 = math.rsqrt %19 : vector<8x1xf32>
    %21 = vector.broadcast %20 : vector<8x1xf32> to vector<8x32xf32>
    %22 = arith.mulf %17, %21 : vector<8x32xf32>
    %23 = vector.broadcast %2 : vector<1x32xf32> to vector<8x32xf32>
    %24 = arith.mulf %22, %23 : vector<8x32xf32>
    %25 = vector.broadcast %4 : vector<1x32xf32> to vector<8x32xf32>
    %26 = arith.addf %24, %25 : vector<8x32xf32>
    %c0_11 = arith.constant 0 : index
    %c0_12 = arith.constant 0 : index
    %c0_13 = arith.constant 0 : index
    %27 = vector.load %arg4[%c0_11, %c0_12, %c0_13] : memref<2x32x192xf32, #tpu.memory_space<vmem>>, vector<1x32x192xf32>
    %28 = vector.shape_cast %27 : vector<1x32x192xf32> to vector<32x192xf32>
    %cst_14 = arith.constant dense<0.000000e+00> : vector<8x192xf32>
    %29 = tpu.matmul %26, %28, %cst_14 {dimension_numbers = #tpu.dot_dimension_numbers<[1], [0], [0], [1], [0, 0, 1, 1], [], []>} : vector<8x32xf32>, vector<32x192xf32>, vector<8x192xf32> -> vector<8x192xf32>
    %30 = vector.extract_strided_slice %29 {offsets = [0, 0], sizes = [8, 16], strides = [1, 1]} : vector<8x192xf32> to vector<8x16xf32>
    %31 = vector.extract_strided_slice %29 {offsets = [0, 64], sizes = [8, 16], strides = [1, 1]} : vector<8x192xf32> to vector<8x16xf32>
    %32 = vector.extract_strided_slice %29 {offsets = [0, 128], sizes = [8, 16], strides = [1, 1]} : vector<8x192xf32> to vector<8x16xf32>
    %cst_15 = arith.constant dense<0.000000e+00> : vector<8x8xf32>
    %33 = tpu.matmul %30, %31, %cst_15 {dimension_numbers = #tpu.dot_dimension_numbers<[1], [1], [0], [0], [0, 0, 1, 0], [], []>} : vector<8x16xf32>, vector<8x16xf32>, vector<8x8xf32> -> vector<8x8xf32>
    %cst_16 = arith.constant 2.500000e-01 : f32
    %34 = vector.broadcast %cst_16 : f32 to vector<8x8xf32>
    %35 = arith.mulf %33, %34 : vector<8x8xf32>
    %cst_17 = arith.constant dense<0xFF800000> : vector<8xf32>
    %36 = vector.multi_reduction <maximumf>, %35, %cst_17 [1] : vector<8x8xf32> to vector<8xf32>
    %37 = vector.shape_cast %36 : vector<8xf32> to vector<8x1xf32>
    %38 = vector.broadcast %37 : vector<8x1xf32> to vector<8x8xf32>
    %39 = arith.subf %35, %38 : vector<8x8xf32>
    %40 = math.exp %39 : vector<8x8xf32>
    %cst_18 = arith.constant dense<0.000000e+00> : vector<8xf32>
    %41 = vector.multi_reduction <add>, %40, %cst_18 [1] : vector<8x8xf32> to vector<8xf32>
    %42 = vector.shape_cast %41 : vector<8xf32> to vector<8x1xf32>
    %43 = tpu.reciprocal %42 {approx = true} : vector<8x1xf32> -> vector<8x1xf32>
    %44 = vector.broadcast %43 : vector<8x1xf32> to vector<8x8xf32>
    %45 = arith.mulf %40, %44 : vector<8x8xf32>
    %cst_19 = arith.constant dense<0.000000e+00> : vector<8x16xf32>
    %46 = tpu.matmul %45, %32, %cst_19 {dimension_numbers = #tpu.dot_dimension_numbers<[1], [0], [0], [1], [0, 0, 1, 1], [], []>} : vector<8x8xf32>, vector<8x16xf32>, vector<8x16xf32> -> vector<8x16xf32>
    %c0_20 = arith.constant 0 : index
    %c0_21 = arith.constant 0 : index
    %47 = vector.load %arg14[%c0_20, %c0_21] : memref<8x64xf32, #tpu.memory_space<vmem>>, vector<8x16xf32>
    tpu.vector_store %arg14[%c0_20, %c0_21], %46 {strides = array<i32>} : memref<8x64xf32, #tpu.memory_space<vmem>>, vector<8x16xf32>,
    %48 = vector.extract_strided_slice %29 {offsets = [0, 16], sizes = [8, 16], strides = [1, 1]} : vector<8x192xf32> to vector<8x16xf32>
    %49 = vector.extract_strided_slice %29 {offsets = [0, 80], sizes = [8, 16], strides = [1, 1]} : vector<8x192xf32> to vector<8x16xf32>
    %50 = vector.extract_strided_slice %29 {offsets = [0, 144], sizes = [8, 16], strides = [1, 1]} : vector<8x192xf32> to vector<8x16xf32>
    %cst_22 = arith.constant dense<0.000000e+00> : vector<8x8xf32>
    %51 = tpu.matmul %48, %49, %cst_22 {dimension_numbers = #tpu.dot_dimension_numbers<[1], [1], [0], [0], [0, 0, 1, 0], [], []>} : vector<8x16xf32>, vector<8x16xf32>, vector<8x8xf32> -> vector<8x8xf32>
    %cst_23 = arith.constant 2.500000e-01 : f32
    %52 = vector.broadcast %cst_23 : f32 to vector<8x8xf32>
    %53 = arith.mulf %51, %52 : vector<8x8xf32>
    %cst_24 = arith.constant dense<0xFF800000> : vector<8xf32>
    %54 = vector.multi_reduction <maximumf>, %53, %cst_24 [1] : vector<8x8xf32> to vector<8xf32>
    %55 = vector.shape_cast %54 : vector<8xf32> to vector<8x1xf32>
    %56 = vector.broadcast %55 : vector<8x1xf32> to vector<8x8xf32>
    %57 = arith.subf %53, %56 : vector<8x8xf32>
    %58 = math.exp %57 : vector<8x8xf32>
    %cst_25 = arith.constant dense<0.000000e+00> : vector<8xf32>
    %59 = vector.multi_reduction <add>, %58, %cst_25 [1] : vector<8x8xf32> to vector<8xf32>
    %60 = vector.shape_cast %59 : vector<8xf32> to vector<8x1xf32>
    %61 = tpu.reciprocal %60 {approx = true} : vector<8x1xf32> -> vector<8x1xf32>
    %62 = vector.broadcast %61 : vector<8x1xf32> to vector<8x8xf32>
    %63 = arith.mulf %58, %62 : vector<8x8xf32>
    %cst_26 = arith.constant dense<0.000000e+00> : vector<8x16xf32>
    %64 = tpu.matmul %63, %50, %cst_26 {dimension_numbers = #tpu.dot_dimension_numbers<[1], [0], [0], [1], [0, 0, 1, 1], [], []>} : vector<8x8xf32>, vector<8x16xf32>, vector<8x16xf32> -> vector<8x16xf32>
    %c0_27 = arith.constant 0 : index
    %c16 = arith.constant 16 : index
    %65 = vector.load %arg14[%c0_27, %c16] : memref<8x64xf32, #tpu.memory_space<vmem>>, vector<8x16xf32>
    tpu.vector_store %arg14[%c0_27, %c16], %64 {strides = array<i32>} : memref<8x64xf32, #tpu.memory_space<vmem>>, vector<8x16xf32>,
    %66 = vector.extract_strided_slice %29 {offsets = [0, 32], sizes = [8, 16], strides = [1, 1]} : vector<8x192xf32> to vector<8x16xf32>
    %67 = vector.extract_strided_slice %29 {offsets = [0, 96], sizes = [8, 16], strides = [1, 1]} : vector<8x192xf32> to vector<8x16xf32>
    %68 = vector.extract_strided_slice %29 {offsets = [0, 160], sizes = [8, 16], strides = [1, 1]} : vector<8x192xf32> to vector<8x16xf32>
    %cst_28 = arith.constant dense<0.000000e+00> : vector<8x8xf32>
    %69 = tpu.matmul %66, %67, %cst_28 {dimension_numbers = #tpu.dot_dimension_numbers<[1], [1], [0], [0], [0, 0, 1, 0], [], []>} : vector<8x16xf32>, vector<8x16xf32>, vector<8x8xf32> -> vector<8x8xf32>
    %cst_29 = arith.constant 2.500000e-01 : f32
    %70 = vector.broadcast %cst_29 : f32 to vector<8x8xf32>
    %71 = arith.mulf %69, %70 : vector<8x8xf32>
    %cst_30 = arith.constant dense<0xFF800000> : vector<8xf32>
    %72 = vector.multi_reduction <maximumf>, %71, %cst_30 [1] : vector<8x8xf32> to vector<8xf32>
    %73 = vector.shape_cast %72 : vector<8xf32> to vector<8x1xf32>
    %74 = vector.broadcast %73 : vector<8x1xf32> to vector<8x8xf32>
    %75 = arith.subf %71, %74 : vector<8x8xf32>
    %76 = math.exp %75 : vector<8x8xf32>
    %cst_31 = arith.constant dense<0.000000e+00> : vector<8xf32>
    %77 = vector.multi_reduction <add>, %76, %cst_31 [1] : vector<8x8xf32> to vector<8xf32>
    %78 = vector.shape_cast %77 : vector<8xf32> to vector<8x1xf32>
    %79 = tpu.reciprocal %78 {approx = true} : vector<8x1xf32> -> vector<8x1xf32>
    %80 = vector.broadcast %79 : vector<8x1xf32> to vector<8x8xf32>
    %81 = arith.mulf %76, %80 : vector<8x8xf32>
    %cst_32 = arith.constant dense<0.000000e+00> : vector<8x16xf32>
    %82 = tpu.matmul %81, %68, %cst_32 {dimension_numbers = #tpu.dot_dimension_numbers<[1], [0], [0], [1], [0, 0, 1, 1], [], []>} : vector<8x8xf32>, vector<8x16xf32>, vector<8x16xf32> -> vector<8x16xf32>
    %c0_33 = arith.constant 0 : index
    %c32 = arith.constant 32 : index
    %83 = vector.load %arg14[%c0_33, %c32] : memref<8x64xf32, #tpu.memory_space<vmem>>, vector<8x16xf32>
    tpu.vector_store %arg14[%c0_33, %c32], %82 {strides = array<i32>} : memref<8x64xf32, #tpu.memory_space<vmem>>, vector<8x16xf32>,
    %84 = vector.extract_strided_slice %29 {offsets = [0, 48], sizes = [8, 16], strides = [1, 1]} : vector<8x192xf32> to vector<8x16xf32>
    %85 = vector.extract_strided_slice %29 {offsets = [0, 112], sizes = [8, 16], strides = [1, 1]} : vector<8x192xf32> to vector<8x16xf32>
    %86 = vector.extract_strided_slice %29 {offsets = [0, 176], sizes = [8, 16], strides = [1, 1]} : vector<8x192xf32> to vector<8x16xf32>
    %cst_34 = arith.constant dense<0.000000e+00> : vector<8x8xf32>
    %87 = tpu.matmul %84, %85, %cst_34 {dimension_numbers = #tpu.dot_dimension_numbers<[1], [1], [0], [0], [0, 0, 1, 0], [], []>} : vector<8x16xf32>, vector<8x16xf32>, vector<8x8xf32> -> vector<8x8xf32>
    %cst_35 = arith.constant 2.500000e-01 : f32
    %88 = vector.broadcast %cst_35 : f32 to vector<8x8xf32>
    %89 = arith.mulf %87, %88 : vector<8x8xf32>
    %cst_36 = arith.constant dense<0xFF800000> : vector<8xf32>
    %90 = vector.multi_reduction <maximumf>, %89, %cst_36 [1] : vector<8x8xf32> to vector<8xf32>
    %91 = vector.shape_cast %90 : vector<8xf32> to vector<8x1xf32>
    %92 = vector.broadcast %91 : vector<8x1xf32> to vector<8x8xf32>
    %93 = arith.subf %89, %92 : vector<8x8xf32>
    %94 = math.exp %93 : vector<8x8xf32>
    %cst_37 = arith.constant dense<0.000000e+00> : vector<8xf32>
    %95 = vector.multi_reduction <add>, %94, %cst_37 [1] : vector<8x8xf32> to vector<8xf32>
    %96 = vector.shape_cast %95 : vector<8xf32> to vector<8x1xf32>
    %97 = tpu.reciprocal %96 {approx = true} : vector<8x1xf32> -> vector<8x1xf32>
    %98 = vector.broadcast %97 : vector<8x1xf32> to vector<8x8xf32>
    %99 = arith.mulf %94, %98 : vector<8x8xf32>
    %cst_38 = arith.constant dense<0.000000e+00> : vector<8x16xf32>
    %100 = tpu.matmul %99, %86, %cst_38 {dimension_numbers = #tpu.dot_dimension_numbers<[1], [0], [0], [1], [0, 0, 1, 1], [], []>} : vector<8x8xf32>, vector<8x16xf32>, vector<8x16xf32> -> vector<8x16xf32>
    %c0_39 = arith.constant 0 : index
    %c48 = arith.constant 48 : index
    %101 = vector.load %arg14[%c0_39, %c48] : memref<8x64xf32, #tpu.memory_space<vmem>>, vector<8x16xf32>
    tpu.vector_store %arg14[%c0_39, %c48], %100 {strides = array<i32>} : memref<8x64xf32, #tpu.memory_space<vmem>>, vector<8x16xf32>,
    %c0_40 = arith.constant 0 : index
    %c0_41 = arith.constant 0 : index
    %102 = vector.load %arg14[%c0_40, %c0_41] : memref<8x64xf32, #tpu.memory_space<vmem>>, vector<8x64xf32>
    %c0_42 = arith.constant 0 : index
    %c0_43 = arith.constant 0 : index
    %c0_44 = arith.constant 0 : index
    %103 = vector.load %arg5[%c0_42, %c0_43, %c0_44] : memref<2x64x32xf32, #tpu.memory_space<vmem>>, vector<1x64x32xf32>
    %104 = vector.shape_cast %103 : vector<1x64x32xf32> to vector<64x32xf32>
    %cst_45 = arith.constant dense<0.000000e+00> : vector<8x32xf32>
    %105 = tpu.matmul %102, %104, %cst_45 {dimension_numbers = #tpu.dot_dimension_numbers<[1], [0], [0], [1], [0, 0, 1, 1], [], []>} : vector<8x64xf32>, vector<64x32xf32>, vector<8x32xf32> -> vector<8x32xf32>
    %c0_46 = arith.constant 0 : index
    %c0_47 = arith.constant 0 : index
    %c0_48 = arith.constant 0 : index
    %106 = vector.load %arg6[%c0_46, %c0_47, %c0_48] : memref<2x1x32xf32, #tpu.memory_space<vmem>>, vector<1x1x32xf32>
    %107 = vector.shape_cast %106 : vector<1x1x32xf32> to vector<1x32xf32>
    %108 = vector.broadcast %107 : vector<1x32xf32> to vector<8x32xf32>
    %109 = arith.addf %105, %108 : vector<8x32xf32>
    %110 = arith.addf %0, %109 : vector<8x32xf32>
    %c0_49 = arith.constant 0 : index
    %c0_50 = arith.constant 0 : index
    %c0_51 = arith.constant 0 : index
    %111 = vector.load %arg7[%c0_49, %c0_50, %c0_51] : memref<2x1x32xf32, #tpu.memory_space<vmem>>, vector<1x1x32xf32>
    %112 = vector.shape_cast %111 : vector<1x1x32xf32> to vector<1x32xf32>
    %c0_52 = arith.constant 0 : index
    %c0_53 = arith.constant 0 : index
    %c0_54 = arith.constant 0 : index
    %113 = vector.load %arg8[%c0_52, %c0_53, %c0_54] : memref<2x1x32xf32, #tpu.memory_space<vmem>>, vector<1x1x32xf32>
    %114 = vector.shape_cast %113 : vector<1x1x32xf32> to vector<1x32xf32>
    %cst_55 = arith.constant dense<0.000000e+00> : vector<8xf32>
    %115 = vector.multi_reduction <add>, %110, %cst_55 [1] : vector<8x32xf32> to vector<8xf32>
    %116 = vector.shape_cast %115 : vector<8xf32> to vector<8x1xf32>
    %cst_56 = arith.constant 3.200000e+01 : f32
    %117 = vector.broadcast %cst_56 : f32 to vector<8x1xf32>
    %118 = arith.divf %116, %117 : vector<8x1xf32>
    %119 = vector.broadcast %118 : vector<8x1xf32> to vector<8x32xf32>
    %120 = arith.subf %110, %119 : vector<8x32xf32>
    %121 = arith.mulf %120, %120 : vector<8x32xf32>
    %cst_57 = arith.constant dense<0.000000e+00> : vector<8xf32>
    %122 = vector.multi_reduction <add>, %121, %cst_57 [1] : vector<8x32xf32> to vector<8xf32>
    %123 = vector.shape_cast %122 : vector<8xf32> to vector<8x1xf32>
    %cst_58 = arith.constant 3.200000e+01 : f32
    %124 = vector.broadcast %cst_58 : f32 to vector<8x1xf32>
    %125 = arith.divf %123, %124 : vector<8x1xf32>
    %126 = vector.broadcast %118 : vector<8x1xf32> to vector<8x32xf32>
    %127 = arith.subf %110, %126 : vector<8x32xf32>
    %cst_59 = arith.constant 9.99999974E-6 : f32
    %128 = vector.broadcast %cst_59 : f32 to vector<8x1xf32>
    %129 = arith.addf %125, %128 : vector<8x1xf32>
    %130 = math.rsqrt %129 : vector<8x1xf32>
    %131 = vector.broadcast %130 : vector<8x1xf32> to vector<8x32xf32>
    %132 = arith.mulf %127, %131 : vector<8x32xf32>
    %133 = vector.broadcast %112 : vector<1x32xf32> to vector<8x32xf32>
    %134 = arith.mulf %132, %133 : vector<8x32xf32>
    %135 = vector.broadcast %114 : vector<1x32xf32> to vector<8x32xf32>
    %136 = arith.addf %134, %135 : vector<8x32xf32>
    %c0_60 = arith.constant 0 : index
    %c0_61 = arith.constant 0 : index
    %c0_62 = arith.constant 0 : index
    %137 = vector.load %arg9[%c0_60, %c0_61, %c0_62] : memref<2x32x64xf32, #tpu.memory_space<vmem>>, vector<1x32x64xf32>
    %138 = vector.shape_cast %137 : vector<1x32x64xf32> to vector<32x64xf32>
    %cst_63 = arith.constant dense<0.000000e+00> : vector<8x64xf32>
    %139 = tpu.matmul %136, %138, %cst_63 {dimension_numbers = #tpu.dot_dimension_numbers<[1], [0], [0], [1], [0, 0, 1, 1], [], []>} : vector<8x32xf32>, vector<32x64xf32>, vector<8x64xf32> -> vector<8x64xf32>
    %c0_64 = arith.constant 0 : index
    %c0_65 = arith.constant 0 : index
    %c0_66 = arith.constant 0 : index
    %140 = vector.load %arg10[%c0_64, %c0_65, %c0_66] : memref<2x1x64xf32, #tpu.memory_space<vmem>>, vector<1x1x64xf32>
    %141 = vector.shape_cast %140 : vector<1x1x64xf32> to vector<1x64xf32>
    %142 = vector.broadcast %141 : vector<1x64xf32> to vector<8x64xf32>
    %143 = arith.addf %139, %142 : vector<8x64xf32>
    %cst_67 = arith.constant 5.000000e-01 : f32
    %144 = vector.broadcast %cst_67 : f32 to vector<8x64xf32>
    %145 = arith.mulf %144, %143 : vector<8x64xf32>
    %cst_68 = arith.constant 2.000000e+00 : f32
    %146 = math.sqrt %cst_68 : f32
    %cst_69 = arith.constant 1.000000e+00 : f32
    %147 = arith.divf %cst_69, %146 : f32
    %148 = vector.broadcast %147 : f32 to vector<8x64xf32>
    %149 = arith.mulf %143, %148 : vector<8x64xf32>
    %150 = math.erf %149 : vector<8x64xf32>
    %cst_70 = arith.constant 1.000000e+00 : f32
    %151 = vector.broadcast %cst_70 : f32 to vector<8x64xf32>
    %152 = arith.addf %151, %150 : vector<8x64xf32>
    %153 = arith.mulf %145, %152 : vector<8x64xf32>
    %c0_71 = arith.constant 0 : index
    %c0_72 = arith.constant 0 : index
    %c0_73 = arith.constant 0 : index
    %154 = vector.load %arg11[%c0_71, %c0_72, %c0_73] : memref<2x64x32xf32, #tpu.memory_space<vmem>>, vector<1x64x32xf32>
    %155 = vector.shape_cast %154 : vector<1x64x32xf32> to vector<64x32xf32>
    %cst_74 = arith.constant dense<0.000000e+00> : vector<8x32xf32>
    %156 = tpu.matmul %153, %155, %cst_74 {dimension_numbers = #tpu.dot_dimension_numbers<[1], [0], [0], [1], [0, 0, 1, 1], [], []>} : vector<8x64xf32>, vector<64x32xf32>, vector<8x32xf32> -> vector<8x32xf32>
    %c0_75 = arith.constant 0 : index
    %c0_76 = arith.constant 0 : index
    %c0_77 = arith.constant 0 : index
    %157 = vector.load %arg12[%c0_75, %c0_76, %c0_77] : memref<2x1x32xf32, #tpu.memory_space<vmem>>, vector<1x1x32xf32>
    %158 = vector.shape_cast %157 : vector<1x1x32xf32> to vector<1x32xf32>
    %159 = vector.broadcast %158 : vector<1x32xf32> to vector<8x32xf32>
    %160 = arith.addf %156, %159 : vector<8x32xf32>
    %161 = arith.addf %110, %160 : vector<8x32xf32>
    %c1 = arith.constant 1 : index
    %c0_78 = arith.constant 0 : index
    %c0_79 = arith.constant 0 : index
    %162 = vector.load %arg2[%c1, %c0_78, %c0_79] : memref<2x1x32xf32, #tpu.memory_space<vmem>>, vector<1x1x32xf32>
    %163 = vector.shape_cast %162 : vector<1x1x32xf32> to vector<1x32xf32>
    %c1_80 = arith.constant 1 : index
    %c0_81 = arith.constant 0 : index
    %c0_82 = arith.constant 0 : index
    %164 = vector.load %arg3[%c1_80, %c0_81, %c0_82] : memref<2x1x32xf32, #tpu.memory_space<vmem>>, vector<1x1x32xf32>
    %165 = vector.shape_cast %164 : vector<1x1x32xf32> to vector<1x32xf32>
    %cst_83 = arith.constant dense<0.000000e+00> : vector<8xf32>
    %166 = vector.multi_reduction <add>, %161, %cst_83 [1] : vector<8x32xf32> to vector<8xf32>
    %167 = vector.shape_cast %166 : vector<8xf32> to vector<8x1xf32>
    %cst_84 = arith.constant 3.200000e+01 : f32
    %168 = vector.broadcast %cst_84 : f32 to vector<8x1xf32>
    %169 = arith.divf %167, %168 : vector<8x1xf32>
    %170 = vector.broadcast %169 : vector<8x1xf32> to vector<8x32xf32>
    %171 = arith.subf %161, %170 : vector<8x32xf32>
    %172 = arith.mulf %171, %171 : vector<8x32xf32>
    %cst_85 = arith.constant dense<0.000000e+00> : vector<8xf32>
    %173 = vector.multi_reduction <add>, %172, %cst_85 [1] : vector<8x32xf32> to vector<8xf32>
    %174 = vector.shape_cast %173 : vector<8xf32> to vector<8x1xf32>
    %cst_86 = arith.constant 3.200000e+01 : f32
    %175 = vector.broadcast %cst_86 : f32 to vector<8x1xf32>
    %176 = arith.divf %174, %175 : vector<8x1xf32>
    %177 = vector.broadcast %169 : vector<8x1xf32> to vector<8x32xf32>
    %178 = arith.subf %161, %177 : vector<8x32xf32>
    %cst_87 = arith.constant 9.99999974E-6 : f32
    %179 = vector.broadcast %cst_87 : f32 to vector<8x1xf32>
    %180 = arith.addf %176, %179 : vector<8x1xf32>
    %181 = math.rsqrt %180 : vector<8x1xf32>
    %182 = vector.broadcast %181 : vector<8x1xf32> to vector<8x32xf32>
    %183 = arith.mulf %178, %182 : vector<8x32xf32>
    %184 = vector.broadcast %163 : vector<1x32xf32> to vector<8x32xf32>
    %185 = arith.mulf %183, %184 : vector<8x32xf32>
    %186 = vector.broadcast %165 : vector<1x32xf32> to vector<8x32xf32>
    %187 = arith.addf %185, %186 : vector<8x32xf32>
    %c1_88 = arith.constant 1 : index
    %c0_89 = arith.constant 0 : index
    %c0_90 = arith.constant 0 : index
    %188 = vector.load %arg4[%c1_88, %c0_89, %c0_90] : memref<2x32x192xf32, #tpu.memory_space<vmem>>, vector<1x32x192xf32>
    %189 = vector.shape_cast %188 : vector<1x32x192xf32> to vector<32x192xf32>
    %cst_91 = arith.constant dense<0.000000e+00> : vector<8x192xf32>
    %190 = tpu.matmul %187, %189, %cst_91 {dimension_numbers = #tpu.dot_dimension_numbers<[1], [0], [0], [1], [0, 0, 1, 1], [], []>} : vector<8x32xf32>, vector<32x192xf32>, vector<8x192xf32> -> vector<8x192xf32>
    %191 = vector.extract_strided_slice %190 {offsets = [0, 0], sizes = [8, 16], strides = [1, 1]} : vector<8x192xf32> to vector<8x16xf32>
    %192 = vector.extract_strided_slice %190 {offsets = [0, 64], sizes = [8, 16], strides = [1, 1]} : vector<8x192xf32> to vector<8x16xf32>
    %193 = vector.extract_strided_slice %190 {offsets = [0, 128], sizes = [8, 16], strides = [1, 1]} : vector<8x192xf32> to vector<8x16xf32>
    %cst_92 = arith.constant dense<0.000000e+00> : vector<8x8xf32>
    %194 = tpu.matmul %191, %192, %cst_92 {dimension_numbers = #tpu.dot_dimension_numbers<[1], [1], [0], [0], [0, 0, 1, 0], [], []>} : vector<8x16xf32>, vector<8x16xf32>, vector<8x8xf32> -> vector<8x8xf32>
    %cst_93 = arith.constant 2.500000e-01 : f32
    %195 = vector.broadcast %cst_93 : f32 to vector<8x8xf32>
    %196 = arith.mulf %194, %195 : vector<8x8xf32>
    %cst_94 = arith.constant dense<0xFF800000> : vector<8xf32>
    %197 = vector.multi_reduction <maximumf>, %196, %cst_94 [1] : vector<8x8xf32> to vector<8xf32>
    %198 = vector.shape_cast %197 : vector<8xf32> to vector<8x1xf32>
    %199 = vector.broadcast %198 : vector<8x1xf32> to vector<8x8xf32>
    %200 = arith.subf %196, %199 : vector<8x8xf32>
    %201 = math.exp %200 : vector<8x8xf32>
    %cst_95 = arith.constant dense<0.000000e+00> : vector<8xf32>
    %202 = vector.multi_reduction <add>, %201, %cst_95 [1] : vector<8x8xf32> to vector<8xf32>
    %203 = vector.shape_cast %202 : vector<8xf32> to vector<8x1xf32>
    %204 = tpu.reciprocal %203 {approx = true} : vector<8x1xf32> -> vector<8x1xf32>
    %205 = vector.broadcast %204 : vector<8x1xf32> to vector<8x8xf32>
    %206 = arith.mulf %201, %205 : vector<8x8xf32>
    %cst_96 = arith.constant dense<0.000000e+00> : vector<8x16xf32>
    %207 = tpu.matmul %206, %193, %cst_96 {dimension_numbers = #tpu.dot_dimension_numbers<[1], [0], [0], [1], [0, 0, 1, 1], [], []>} : vector<8x8xf32>, vector<8x16xf32>, vector<8x16xf32> -> vector<8x16xf32>
    %c0_97 = arith.constant 0 : index
    %c0_98 = arith.constant 0 : index
    %208 = vector.load %arg14[%c0_97, %c0_98] : memref<8x64xf32, #tpu.memory_space<vmem>>, vector<8x16xf32>
    tpu.vector_store %arg14[%c0_97, %c0_98], %207 {strides = array<i32>} : memref<8x64xf32, #tpu.memory_space<vmem>>, vector<8x16xf32>,
    %209 = vector.extract_strided_slice %190 {offsets = [0, 16], sizes = [8, 16], strides = [1, 1]} : vector<8x192xf32> to vector<8x16xf32>
    %210 = vector.extract_strided_slice %190 {offsets = [0, 80], sizes = [8, 16], strides = [1, 1]} : vector<8x192xf32> to vector<8x16xf32>
    %211 = vector.extract_strided_slice %190 {offsets = [0, 144], sizes = [8, 16], strides = [1, 1]} : vector<8x192xf32> to vector<8x16xf32>
    %cst_99 = arith.constant dense<0.000000e+00> : vector<8x8xf32>
    %212 = tpu.matmul %209, %210, %cst_99 {dimension_numbers = #tpu.dot_dimension_numbers<[1], [1], [0], [0], [0, 0, 1, 0], [], []>} : vector<8x16xf32>, vector<8x16xf32>, vector<8x8xf32> -> vector<8x8xf32>
    %cst_100 = arith.constant 2.500000e-01 : f32
    %213 = vector.broadcast %cst_100 : f32 to vector<8x8xf32>
    %214 = arith.mulf %212, %213 : vector<8x8xf32>
    %cst_101 = arith.constant dense<0xFF800000> : vector<8xf32>
    %215 = vector.multi_reduction <maximumf>, %214, %cst_101 [1] : vector<8x8xf32> to vector<8xf32>
    %216 = vector.shape_cast %215 : vector<8xf32> to vector<8x1xf32>
    %217 = vector.broadcast %216 : vector<8x1xf32> to vector<8x8xf32>
    %218 = arith.subf %214, %217 : vector<8x8xf32>
    %219 = math.exp %218 : vector<8x8xf32>
    %cst_102 = arith.constant dense<0.000000e+00> : vector<8xf32>
    %220 = vector.multi_reduction <add>, %219, %cst_102 [1] : vector<8x8xf32> to vector<8xf32>
    %221 = vector.shape_cast %220 : vector<8xf32> to vector<8x1xf32>
    %222 = tpu.reciprocal %221 {approx = true} : vector<8x1xf32> -> vector<8x1xf32>
    %223 = vector.broadcast %222 : vector<8x1xf32> to vector<8x8xf32>
    %224 = arith.mulf %219, %223 : vector<8x8xf32>
    %cst_103 = arith.constant dense<0.000000e+00> : vector<8x16xf32>
    %225 = tpu.matmul %224, %211, %cst_103 {dimension_numbers = #tpu.dot_dimension_numbers<[1], [0], [0], [1], [0, 0, 1, 1], [], []>} : vector<8x8xf32>, vector<8x16xf32>, vector<8x16xf32> -> vector<8x16xf32>
    %c0_104 = arith.constant 0 : index
    %c16_105 = arith.constant 16 : index
    %226 = vector.load %arg14[%c0_104, %c16_105] : memref<8x64xf32, #tpu.memory_space<vmem>>, vector<8x16xf32>
    tpu.vector_store %arg14[%c0_104, %c16_105], %225 {strides = array<i32>} : memref<8x64xf32, #tpu.memory_space<vmem>>, vector<8x16xf32>,
    %227 = vector.extract_strided_slice %190 {offsets = [0, 32], sizes = [8, 16], strides = [1, 1]} : vector<8x192xf32> to vector<8x16xf32>
    %228 = vector.extract_strided_slice %190 {offsets = [0, 96], sizes = [8, 16], strides = [1, 1]} : vector<8x192xf32> to vector<8x16xf32>
    %229 = vector.extract_strided_slice %190 {offsets = [0, 160], sizes = [8, 16], strides = [1, 1]} : vector<8x192xf32> to vector<8x16xf32>
    %cst_106 = arith.constant dense<0.000000e+00> : vector<8x8xf32>
    %230 = tpu.matmul %227, %228, %cst_106 {dimension_numbers = #tpu.dot_dimension_numbers<[1], [1], [0], [0], [0, 0, 1, 0], [], []>} : vector<8x16xf32>, vector<8x16xf32>, vector<8x8xf32> -> vector<8x8xf32>
    %cst_107 = arith.constant 2.500000e-01 : f32
    %231 = vector.broadcast %cst_107 : f32 to vector<8x8xf32>
    %232 = arith.mulf %230, %231 : vector<8x8xf32>
    %cst_108 = arith.constant dense<0xFF800000> : vector<8xf32>
    %233 = vector.multi_reduction <maximumf>, %232, %cst_108 [1] : vector<8x8xf32> to vector<8xf32>
    %234 = vector.shape_cast %233 : vector<8xf32> to vector<8x1xf32>
    %235 = vector.broadcast %234 : vector<8x1xf32> to vector<8x8xf32>
    %236 = arith.subf %232, %235 : vector<8x8xf32>
    %237 = math.exp %236 : vector<8x8xf32>
    %cst_109 = arith.constant dense<0.000000e+00> : vector<8xf32>
    %238 = vector.multi_reduction <add>, %237, %cst_109 [1] : vector<8x8xf32> to vector<8xf32>
    %239 = vector.shape_cast %238 : vector<8xf32> to vector<8x1xf32>
    %240 = tpu.reciprocal %239 {approx = true} : vector<8x1xf32> -> vector<8x1xf32>
    %241 = vector.broadcast %240 : vector<8x1xf32> to vector<8x8xf32>
    %242 = arith.mulf %237, %241 : vector<8x8xf32>
    %cst_110 = arith.constant dense<0.000000e+00> : vector<8x16xf32>
    %243 = tpu.matmul %242, %229, %cst_110 {dimension_numbers = #tpu.dot_dimension_numbers<[1], [0], [0], [1], [0, 0, 1, 1], [], []>} : vector<8x8xf32>, vector<8x16xf32>, vector<8x16xf32> -> vector<8x16xf32>
    %c0_111 = arith.constant 0 : index
    %c32_112 = arith.constant 32 : index
    %244 = vector.load %arg14[%c0_111, %c32_112] : memref<8x64xf32, #tpu.memory_space<vmem>>, vector<8x16xf32>
    tpu.vector_store %arg14[%c0_111, %c32_112], %243 {strides = array<i32>} : memref<8x64xf32, #tpu.memory_space<vmem>>, vector<8x16xf32>,
    %245 = vector.extract_strided_slice %190 {offsets = [0, 48], sizes = [8, 16], strides = [1, 1]} : vector<8x192xf32> to vector<8x16xf32>
    %246 = vector.extract_strided_slice %190 {offsets = [0, 112], sizes = [8, 16], strides = [1, 1]} : vector<8x192xf32> to vector<8x16xf32>
    %247 = vector.extract_strided_slice %190 {offsets = [0, 176], sizes = [8, 16], strides = [1, 1]} : vector<8x192xf32> to vector<8x16xf32>
    %cst_113 = arith.constant dense<0.000000e+00> : vector<8x8xf32>
    %248 = tpu.matmul %245, %246, %cst_113 {dimension_numbers = #tpu.dot_dimension_numbers<[1], [1], [0], [0], [0, 0, 1, 0], [], []>} : vector<8x16xf32>, vector<8x16xf32>, vector<8x8xf32> -> vector<8x8xf32>
    %cst_114 = arith.constant 2.500000e-01 : f32
    %249 = vector.broadcast %cst_114 : f32 to vector<8x8xf32>
    %250 = arith.mulf %248, %249 : vector<8x8xf32>
    %cst_115 = arith.constant dense<0xFF800000> : vector<8xf32>
    %251 = vector.multi_reduction <maximumf>, %250, %cst_115 [1] : vector<8x8xf32> to vector<8xf32>
    %252 = vector.shape_cast %251 : vector<8xf32> to vector<8x1xf32>
    %253 = vector.broadcast %252 : vector<8x1xf32> to vector<8x8xf32>
    %254 = arith.subf %250, %253 : vector<8x8xf32>
    %255 = math.exp %254 : vector<8x8xf32>
    %cst_116 = arith.constant dense<0.000000e+00> : vector<8xf32>
    %256 = vector.multi_reduction <add>, %255, %cst_116 [1] : vector<8x8xf32> to vector<8xf32>
    %257 = vector.shape_cast %256 : vector<8xf32> to vector<8x1xf32>
    %258 = tpu.reciprocal %257 {approx = true} : vector<8x1xf32> -> vector<8x1xf32>
    %259 = vector.broadcast %258 : vector<8x1xf32> to vector<8x8xf32>
    %260 = arith.mulf %255, %259 : vector<8x8xf32>
    %cst_117 = arith.constant dense<0.000000e+00> : vector<8x16xf32>
    %261 = tpu.matmul %260, %247, %cst_117 {dimension_numbers = #tpu.dot_dimension_numbers<[1], [0], [0], [1], [0, 0, 1, 1], [], []>} : vector<8x8xf32>, vector<8x16xf32>, vector<8x16xf32> -> vector<8x16xf32>
    %c0_118 = arith.constant 0 : index
    %c48_119 = arith.constant 48 : index
    %262 = vector.load %arg14[%c0_118, %c48_119] : memref<8x64xf32, #tpu.memory_space<vmem>>, vector<8x16xf32>
    tpu.vector_store %arg14[%c0_118, %c48_119], %261 {strides = array<i32>} : memref<8x64xf32, #tpu.memory_space<vmem>>, vector<8x16xf32>,
    %c0_120 = arith.constant 0 : index
    %c0_121 = arith.constant 0 : index
    %263 = vector.load %arg14[%c0_120, %c0_121] : memref<8x64xf32, #tpu.memory_space<vmem>>, vector<8x64xf32>
    %c1_122 = arith.constant 1 : index
    %c0_123 = arith.constant 0 : index
    %c0_124 = arith.constant 0 : index
    %264 = vector.load %arg5[%c1_122, %c0_123, %c0_124] : memref<2x64x32xf32, #tpu.memory_space<vmem>>, vector<1x64x32xf32>
    %265 = vector.shape_cast %264 : vector<1x64x32xf32> to vector<64x32xf32>
    %cst_125 = arith.constant dense<0.000000e+00> : vector<8x32xf32>
    %266 = tpu.matmul %263, %265, %cst_125 {dimension_numbers = #tpu.dot_dimension_numbers<[1], [0], [0], [1], [0, 0, 1, 1], [], []>} : vector<8x64xf32>, vector<64x32xf32>, vector<8x32xf32> -> vector<8x32xf32>
    %c1_126 = arith.constant 1 : index
    %c0_127 = arith.constant 0 : index
    %c0_128 = arith.constant 0 : index
    %267 = vector.load %arg6[%c1_126, %c0_127, %c0_128] : memref<2x1x32xf32, #tpu.memory_space<vmem>>, vector<1x1x32xf32>
    %268 = vector.shape_cast %267 : vector<1x1x32xf32> to vector<1x32xf32>
    %269 = vector.broadcast %268 : vector<1x32xf32> to vector<8x32xf32>
    %270 = arith.addf %266, %269 : vector<8x32xf32>
    %271 = arith.addf %161, %270 : vector<8x32xf32>
    %c1_129 = arith.constant 1 : index
    %c0_130 = arith.constant 0 : index
    %c0_131 = arith.constant 0 : index
    %272 = vector.load %arg7[%c1_129, %c0_130, %c0_131] : memref<2x1x32xf32, #tpu.memory_space<vmem>>, vector<1x1x32xf32>
    %273 = vector.shape_cast %272 : vector<1x1x32xf32> to vector<1x32xf32>
    %c1_132 = arith.constant 1 : index
    %c0_133 = arith.constant 0 : index
    %c0_134 = arith.constant 0 : index
    %274 = vector.load %arg8[%c1_132, %c0_133, %c0_134] : memref<2x1x32xf32, #tpu.memory_space<vmem>>, vector<1x1x32xf32>
    %275 = vector.shape_cast %274 : vector<1x1x32xf32> to vector<1x32xf32>
    %cst_135 = arith.constant dense<0.000000e+00> : vector<8xf32>
    %276 = vector.multi_reduction <add>, %271, %cst_135 [1] : vector<8x32xf32> to vector<8xf32>
    %277 = vector.shape_cast %276 : vector<8xf32> to vector<8x1xf32>
    %cst_136 = arith.constant 3.200000e+01 : f32
    %278 = vector.broadcast %cst_136 : f32 to vector<8x1xf32>
    %279 = arith.divf %277, %278 : vector<8x1xf32>
    %280 = vector.broadcast %279 : vector<8x1xf32> to vector<8x32xf32>
    %281 = arith.subf %271, %280 : vector<8x32xf32>
    %282 = arith.mulf %281, %281 : vector<8x32xf32>
    %cst_137 = arith.constant dense<0.000000e+00> : vector<8xf32>
    %283 = vector.multi_reduction <add>, %282, %cst_137 [1] : vector<8x32xf32> to vector<8xf32>
    %284 = vector.shape_cast %283 : vector<8xf32> to vector<8x1xf32>
    %cst_138 = arith.constant 3.200000e+01 : f32
    %285 = vector.broadcast %cst_138 : f32 to vector<8x1xf32>
    %286 = arith.divf %284, %285 : vector<8x1xf32>
    %287 = vector.broadcast %279 : vector<8x1xf32> to vector<8x32xf32>
    %288 = arith.subf %271, %287 : vector<8x32xf32>
    %cst_139 = arith.constant 9.99999974E-6 : f32
    %289 = vector.broadcast %cst_139 : f32 to vector<8x1xf32>
    %290 = arith.addf %286, %289 : vector<8x1xf32>
    %291 = math.rsqrt %290 : vector<8x1xf32>
    %292 = vector.broadcast %291 : vector<8x1xf32> to vector<8x32xf32>
    %293 = arith.mulf %288, %292 : vector<8x32xf32>
    %294 = vector.broadcast %273 : vector<1x32xf32> to vector<8x32xf32>
    %295 = arith.mulf %293, %294 : vector<8x32xf32>
    %296 = vector.broadcast %275 : vector<1x32xf32> to vector<8x32xf32>
    %297 = arith.addf %295, %296 : vector<8x32xf32>
    %c1_140 = arith.constant 1 : index
    %c0_141 = arith.constant 0 : index
    %c0_142 = arith.constant 0 : index
    %298 = vector.load %arg9[%c1_140, %c0_141, %c0_142] : memref<2x32x64xf32, #tpu.memory_space<vmem>>, vector<1x32x64xf32>
    %299 = vector.shape_cast %298 : vector<1x32x64xf32> to vector<32x64xf32>
    %cst_143 = arith.constant dense<0.000000e+00> : vector<8x64xf32>
    %300 = tpu.matmul %297, %299, %cst_143 {dimension_numbers = #tpu.dot_dimension_numbers<[1], [0], [0], [1], [0, 0, 1, 1], [], []>} : vector<8x32xf32>, vector<32x64xf32>, vector<8x64xf32> -> vector<8x64xf32>
    %c1_144 = arith.constant 1 : index
    %c0_145 = arith.constant 0 : index
    %c0_146 = arith.constant 0 : index
    %301 = vector.load %arg10[%c1_144, %c0_145, %c0_146] : memref<2x1x64xf32, #tpu.memory_space<vmem>>, vector<1x1x64xf32>
    %302 = vector.shape_cast %301 : vector<1x1x64xf32> to vector<1x64xf32>
    %303 = vector.broadcast %302 : vector<1x64xf32> to vector<8x64xf32>
    %304 = arith.addf %300, %303 : vector<8x64xf32>
    %cst_147 = arith.constant 5.000000e-01 : f32
    %305 = vector.broadcast %cst_147 : f32 to vector<8x64xf32>
    %306 = arith.mulf %305, %304 : vector<8x64xf32>
    %cst_148 = arith.constant 2.000000e+00 : f32
    %307 = math.sqrt %cst_148 : f32
    %cst_149 = arith.constant 1.000000e+00 : f32
    %308 = arith.divf %cst_149, %307 : f32
    %309 = vector.broadcast %308 : f32 to vector<8x64xf32>
    %310 = arith.mulf %304, %309 : vector<8x64xf32>
    %311 = math.erf %310 : vector<8x64xf32>
    %cst_150 = arith.constant 1.000000e+00 : f32
    %312 = vector.broadcast %cst_150 : f32 to vector<8x64xf32>
    %313 = arith.addf %312, %311 : vector<8x64xf32>
    %314 = arith.mulf %306, %313 : vector<8x64xf32>
    %c1_151 = arith.constant 1 : index
    %c0_152 = arith.constant 0 : index
    %c0_153 = arith.constant 0 : index
    %315 = vector.load %arg11[%c1_151, %c0_152, %c0_153] : memref<2x64x32xf32, #tpu.memory_space<vmem>>, vector<1x64x32xf32>
    %316 = vector.shape_cast %315 : vector<1x64x32xf32> to vector<64x32xf32>
    %cst_154 = arith.constant dense<0.000000e+00> : vector<8x32xf32>
    %317 = tpu.matmul %314, %316, %cst_154 {dimension_numbers = #tpu.dot_dimension_numbers<[1], [0], [0], [1], [0, 0, 1, 1], [], []>} : vector<8x64xf32>, vector<64x32xf32>, vector<8x32xf32> -> vector<8x32xf32>
    %c1_155 = arith.constant 1 : index
    %c0_156 = arith.constant 0 : index
    %c0_157 = arith.constant 0 : index
    %318 = vector.load %arg12[%c1_155, %c0_156, %c0_157] : memref<2x1x32xf32, #tpu.memory_space<vmem>>, vector<1x1x32xf32>
    %319 = vector.shape_cast %318 : vector<1x1x32xf32> to vector<1x32xf32>
    %320 = vector.broadcast %319 : vector<1x32xf32> to vector<8x32xf32>
    %321 = arith.addf %317, %320 : vector<8x32xf32>
    %322 = arith.addf %271, %321 : vector<8x32xf32>
    %c0_158 = arith.constant 0 : index
    %c0_159 = arith.constant 0 : index
    %323 = vector.load %arg13[%c0_158, %c0_159] : memref<8x32xf32, #tpu.memory_space<vmem>>, vector<8x32xf32>
    tpu.vector_store %arg13[%c0_158, %c0_159], %322 {strides = array<i32>} : memref<8x32xf32, #tpu.memory_space<vmem>>, vector<8x32xf32>,
    return
  }
  func.func @transform_0(%arg0: i32) -> (i32, i32) {
    %c0_i32 = arith.constant 0 : i32
    %c0_i32_0 = arith.constant 0 : i32
    return %arg0, %c0_i32 : i32, i32
  }
  func.func @transform_1(%arg0: i32) -> (i32, i32, i32) {
    %c0_i32 = arith.constant 0 : i32
    %c0_i32_0 = arith.constant 0 : i32
    %c0_i32_1 = arith.constant 0 : i32
    %c0_i32_2 = arith.constant 0 : i32
    return %c0_i32, %c0_i32_0, %c0_i32_1 : i32, i32, i32
  }
  func.func @transform_2(%arg0: i32) -> (i32, i32, i32) {
    %c0_i32 = arith.constant 0 : i32
    %c0_i32_0 = arith.constant 0 : i32
    %c0_i32_1 = arith.constant 0 : i32
    %c0_i32_2 = arith.constant 0 : i32
    return %c0_i32, %c0_i32_0, %c0_i32_1 : i32, i32, i32
  }
  func.func @transform_3(%arg0: i32) -> (i32, i32, i32) {
    %c0_i32 = arith.constant 0 : i32
    %c0_i32_0 = arith.constant 0 : i32
    %c0_i32_1 = arith.constant 0 : i32
    %c0_i32_2 = arith.constant 0 : i32
    return %c0_i32, %c0_i32_0, %c0_i32_1 : i32, i32, i32
  }
  func.func @transform_4(%arg0: i32) -> (i32, i32, i32) {
    %c0_i32 = arith.constant 0 : i32
    %c0_i32_0 = arith.constant 0 : i32
    %c0_i32_1 = arith.constant 0 : i32
    %c0_i32_2 = arith.constant 0 : i32
    return %c0_i32, %c0_i32_0, %c0_i32_1 : i32, i32, i32
  }
  func.func @transform_5(%arg0: i32) -> (i32, i32, i32) {
    %c0_i32 = arith.constant 0 : i32
    %c0_i32_0 = arith.constant 0 : i32
    %c0_i32_1 = arith.constant 0 : i32
    %c0_i32_2 = arith.constant 0 : i32
    return %c0_i32, %c0_i32_0, %c0_i32_1 : i32, i32, i32
  }
  func.func @transform_6(%arg0: i32) -> (i32, i32, i32) {
    %c0_i32 = arith.constant 0 : i32
    %c0_i32_0 = arith.constant 0 : i32
    %c0_i32_1 = arith.constant 0 : i32
    %c0_i32_2 = arith.constant 0 : i32
    return %c0_i32, %c0_i32_0, %c0_i32_1 : i32, i32, i32
  }
  func.func @transform_7(%arg0: i32) -> (i32, i32, i32) {
    %c0_i32 = arith.constant 0 : i32
    %c0_i32_0 = arith.constant 0 : i32
    %c0_i32_1 = arith.constant 0 : i32
    %c0_i32_2 = arith.constant 0 : i32
    return %c0_i32, %c0_i32_0, %c0_i32_1 : i32, i32, i32
  }
  func.func @transform_8(%arg0: i32) -> (i32, i32, i32) {
    %c0_i32 = arith.constant 0 : i32
    %c0_i32_0 = arith.constant 0 : i32
    %c0_i32_1 = arith.constant 0 : i32
    %c0_i32_2 = arith.constant 0 : i32
    return %c0_i32, %c0_i32_0, %c0_i32_1 : i32, i32, i32
  }
  func.func @transform_9(%arg0: i32) -> (i32, i32, i32) {
    %c0_i32 = arith.constant 0 : i32
    %c0_i32_0 = arith.constant 0 : i32
    %c0_i32_1 = arith.constant 0 : i32
    %c0_i32_2 = arith.constant 0 : i32
    return %c0_i32, %c0_i32_0, %c0_i32_1 : i32, i32, i32
  }
  func.func @transform_10(%arg0: i32) -> (i32, i32, i32) {
    %c0_i32 = arith.constant 0 : i32
    %c0_i32_0 = arith.constant 0 : i32
    %c0_i32_1 = arith.constant 0 : i32
    %c0_i32_2 = arith.constant 0 : i32
    return %c0_i32, %c0_i32_0, %c0_i32_1 : i32, i32, i32
  }
  func.func @transform_11(%arg0: i32) -> (i32, i32, i32) {
    %c0_i32 = arith.constant 0 : i32
    %c0_i32_0 = arith.constant 0 : i32
    %c0_i32_1 = arith.constant 0 : i32
    %c0_i32_2 = arith.constant 0 : i32
    return %c0_i32, %c0_i32_0, %c0_i32_1 : i32, i32, i32
  }
  func.func @transform_12(%arg0: i32) -> (i32, i32) {
    %c0_i32 = arith.constant 0 : i32
    %c0_i32_0 = arith.constant 0 : i32
    return %arg0, %c0_i32 : i32, i32
  }
}

</mosaic_0001>

<bundles_post_ra>
// kernel: tpu_custom_call.1
= control target key start
LH: loop header
LB: loop body
LE: loop exit
PB: predicated region body
PF: predicated region fallthrough
CT: control target
= control target key end

     0   :  { %s3844_s0 = inlined_call_operand.vmem [shape: f32[16,32], index: 0, kind: input, shape index: {}]   ;;  %s3845_s1 = inlined_call_operand.vmem [shape: f32[2,1,32], index: 1, kind: input, shape index: {}]   ;;  %s3846_s2 = inlined_call_operand.vmem [shape: f32[2,1,32], index: 2, kind: input, shape index: {}]   ;;  %s3847_s3 = inlined_call_operand.vmem [shape: f32[2,32,192], index: 3, kind: input, shape index: {}]   ;;  %s3848_s4 = inlined_call_operand.vmem [shape: f32[2,64,32], index: 4, kind: input, shape index: {}]   ;;  %s3849_s5 = inlined_call_operand.vmem [shape: f32[2,1,32], index: 5, kind: input, shape index: {}]   ;;  %s3850_s6 = inlined_call_operand.vmem [shape: f32[2,1,32], index: 6, kind: input, shape index: {}]   ;;  %s3851_s7 = inlined_call_operand.vmem [shape: f32[2,1,32], index: 7, kind: input, shape index: {}]   ;;  %s3852_s8 = inlined_call_operand.vmem [shape: f32[2,32,64], index: 8, kind: input, shape index: {}]   ;;  %s3853_s9 = inlined_call_operand.vmem [shape: f32[2,1,64], index: 9, kind: input, shape index: {}]   ;;  %s3854_s10 = inlined_call_operand.vmem [shape: f32[2,64,32], index: 10, kind: input, shape index: {}]   ;;  %s3855_s11 = inlined_call_operand.vmem [shape: f32[2,1,32], index: 11, kind: input, shape index: {}]   ;;  %s3856_s12 = inlined_call_operand.hbm [shape: f32[16,32], index: 12, kind: output, shape index: {}]  }
   0x1   :  { %3868 = sst [smem:[#allocation7_spill]] %s3844_s0 }
   0x2   :  { %17 = vsyncpa [#allocation4], 0 }
   0x3   :  { %19 = vsyncpa [#allocation4 + $0x1], 0  ;;  %s3329_s21 = smov 0   ;;  %s3331_s22 = smov 0  }
   0x4   :  { %s3333_s23 = smov 0   ;;  %s3335_s24 = smov 0  }
   0x5 LB: > { %s3350_s25 = sadd.s32 4294967295, %s3251_s24   ;;  %s2673_s26 = sadd.s32 4294967294, %s3251_s24   ;;  %s3251_s24 = sphi %s3335_s24, %s3883_s24   ;;  %s3247_s23 = sphi %s3333_s23, %s3882_s23   ;;  %s3243_s22 = sphi %s3331_s22, %s3881_s22   ;;  %s3239_s21 = sphi %s3329_s21, %s3880_s21  }
   0x6   : > { %s3354_s27 = sadd.s32 1, %s3251_s24   ;;  %s289_s28 = sadd.s32 1, %s3247_s23 }
   0x7   : > { %s286_s29 = ssub.s32 %s3251_s24, %s3354_s27  ;;  %p299_p0 = scmp.ne.s32.totalorder %s3247_s23, %s3243_s22 }
   0x8   : > { %p287_p1 = scmp.eq.s32.totalorder %s286_s29, 0  ;;  %p300_p2 = scmp.eq.s32.totalorder %s3350_s25, 1 }
   0x9   : > { %p305_p3 = scmp.ne.s32.totalorder %s3243_s22, %s3239_s21  ;;  %p306_p4 = scmp.eq.s32.totalorder %s2673_s26, 1 }
   0xa   : > { %s3365_s30 = scalar_select %p287_p1, %s3247_s23, %s289_s28  }
   0xb   : > { %p3367_p5 = por %p300_p2, %p299_p0  ;;  %p3371_p6 = por %p306_p4, %p305_p3 }
   0xc   : > { %3869 = sst [smem:[#allocation6_spill]] %s3365_s30  ;;  %p2676_p7 = scmp.ge.s32.totalorder %s3251_s24, 1 }
   0xd   : > { %p364_p8 = scmp.lt.s32.totalorder %s3251_s24, 3 }
   0xf   : > { %p365_p9 = pnand %p2676_p7, %p364_p8 }
  0x10   : > { %p405_p10 = scmp.lt.s32.totalorder (!%p365_p9), %s3350_s25, 1  ;;  %vm412_vm0 = vcmask (!%p365_p9), 261120   ;;  %s3872_s0 = sld [smem:[#allocation7_spill]] (!%p365_p9)  ;;  %v442_v7 = vld [vmem:[%s3847_s3 + $0x8] sm:$0xff] (!%p365_p9)  ;;  %v444_v8 = vld [vmem:[%s3847_s3 + $0x18] sm:$0xff] (!%p365_p9)  ;;  %v441_v9 = vld [vmem:[%s3847_s3] sm:$0xff] (!%p365_p9) }
  0x11   : > { %368 = sbr.rel (%p365_p9) target bundleno = 5081 (0x13d9), region = 68  ;;  %v3020_v10 = vpack.c.bf16 (!%p365_p9), %v444_v8, %v442_v7  ;;  %v443_v11 = vld [vmem:[%s3847_s3 + $0x10] sm:$0xff] (!%p365_p9)  ;;  %v446_v12 = vld [vmem:[%s3847_s3 + $0x28] sm:$0xff] (!%p365_p9)  ;;  %v448_v13 = vld [vmem:[%s3847_s3 + $0x38] sm:$0xff] (!%p365_p9)  ;;  %v3253_v14 = vmov (!%p365_p9), 0.0   ;;  %vm3254_vm1 = vmmov (!%p365_p9), 0  }
  0x12   : > { %516 = vmatprep.mubr.f32.mxu0 (!%p365_p9), %v3253_v14  ;;  %2847 = vmatprep.subr.mxu1 (!%p365_p9), %v3253_v14  ;;  %v3022_v15 = vpack.c.bf16 (!%p365_p9), %v443_v11, %v441_v9  ;;  %v3024_v16 = vpack.c.bf16 (!%p365_p9), %v448_v13, %v446_v12  ;;  %v445_v17 = vld [vmem:[%s3847_s3 + $0x20] sm:$0xff] (!%p365_p9)  ;;  %v447_v18 = vld [vmem:[%s3847_s3 + $0x30] sm:$0xff] (!%p365_p9)  ;;  %s3859_s18 = smov (!%p365_p9), 112   ;;  %s3257_s20 = smov (!%p365_p9), 48   ;;  %vm526_vm2 = vcmask (!%p365_p9), 130048   ;;  %vm602_vm3 = vcmask (!%p365_p9), 64512  }
  0x13   : > { %3021 = vmatprep.subr.bf16.mxu0 (!%p365_p9), %v3020_v10  ;;  %v3026_v19 = vpack.c.bf16 (!%p365_p9), %v447_v18, %v445_v17  ;;  %v2679_v24 = vld [vmem:[%s3845_s1] ss:$0 sm:$0xff] (!%p365_p9)  ;;  %2849 = vmatprep.mubr.msk.f32.mxu1 (!%p365_p9), %vm3254_vm1, %v3253_v14  ;;  %s3866_s26 = smov (!%p365_p9), 32   ;;  %s3861_s28 = smov (!%p365_p9), 96   ;;  %vm859_vm4 = vcmask (!%p365_p9), 261248   ;;  %vm1031_vm5 = vcmask (!%p365_p9), 392448  }
  0x14   : > { %3023 = vmatpush1.bf16.msra.mxu0 (!%p365_p9), %v3022_v15  ;;  %v2680_v26 = vld [vmem:[%s3846_s2] ss:$0 sm:$0xff] (!%p365_p9)  ;;  %s3864_s29 = smov (!%p365_p9), 16   ;;  %vm1203_vm6 = vcmask (!%p365_p9), 523648   ;;  %vm1221_vm7 = vcmask (!%p365_p9), 523264   ;;  %s3876_s30 = smov (!%p365_p9), 80  }
  0x15   : > { %3025 = vmatprep.subr.bf16.mxu0 (!%p365_p9), %v3024_v16  ;;  %s3878_s17 = smov (!%p365_p9), 16  }
  0x18   : > { %s406_s15 = scalar_select %p405_p10, %s3350_s25, 1  ;;  %3027 = vmatpush1.bf16.msra.mxu0 %v3026_v19 }
  0x19   : > { %2842 = vmatprep.subr.mxu0 %v3253_v14 }
  0x1a   : > { %s2678_s16 = sshll.u32 %s406_s15, 3  ;;  %s3857_s15 = smov 80  }
  0x1b   : > { %s408_s19 = scalar_lea.vmem %s3872_s0, %s2678_s16  ;;  %s3875_s0 = smov 112  }
  0x1c   : > { %v3382_v0 = vld [vmem:[%s408_s19] sm:$0xff]  ;;  %s3863_s19 = smov 64   ;;  %s3877_s16 = smov 32  }
  0x1d   : > { %v413_v1 = vsel %vm412_vm0, %v3382_v0, 0.0 }
  0x1e   : > { %414 = vadd.xlane.f32.xlu0 %v413_v1 }
  0xab   : > { %v415_v2 = vpop.xlane.xlu0 %414 }
  0xac   : > { %v417_v3 = vmul.f32 0.03125, %v415_v2 }
  0xae   : > { %v418_v4 = vsub.f32 %v3382_v0, %v417_v3 }
  0xb0   : > { %v419_v5 = vmul.f32 %v418_v4, %v418_v4 }
  0xb2   : > { %v420_v6 = vsel %vm412_vm0, %v419_v5, 0.0 }
  0xb3   : > { %421 = vadd.xlane.f32.xlu0 %v420_v6 }
 0x140   : > { %v422_v20 = vpop.xlane.xlu0 %421 }
 0x141   : > { %v423_v21 = vmul.f32 0.03125, %v422_v20 }
 0x143   : > { %v424_v22 = vadd.f32 1e-05, %v423_v21 }
 0x145   : > { %3145 = vrsqrt.f32 %v424_v22 }
 0x14f   : > { %v3146_v23 = vpop.eup %3145 }
 0x150   : > { %v426_v25 = vmul.f32 %v3146_v23, %v418_v4 }
 0x152   : > { %v433_v27 = vmul.f32 %v2679_v24, %v426_v25 }
 0x154   : > { %v440_v28 = vadd.f32 %v2680_v26, %v433_v27  ;;  %v1206_v27 = vld [vmem:[%s3848_s4] sm:$0xff] }
 0x156   : > { %2681 = vmatmul.mubr.msk.f32.vlgmr.msra.gmra.mrb[0].mxu0 %vm412_vm0, %v440_v28  ;;  %v1207_v28 = vld [vmem:[%s3848_s4 + $0x8] sm:$0xff] }
 0x157   : > { %2844 = vmatprep.mubr.msk.f32.mxu0 %vm3254_vm1, %v3253_v14 }
 0x229   : > { %v518_v29 = vpop.f32.mrb[0].mxu0 }
 0x22a   : > { %688 = vrot.lane.b32.xlu0 %v518_v29, %s3859_s18  ;;  %524 = vrot.lane.b32.xlu1 %v518_v29, %s3863_s19  ;;  %v3428_v30 = vpop.f32.mrb[1].mxu0 }
 0x22b   : > { %2848 = vmatpush3.msra.mxu1 %v3428_v30 }
 0x22c   : > { %2857 = vmatprep.subr.mxu1 %v3253_v14 }
 0x22e   : > { %690 = vrot.lane.b32.xlu1 %v518_v29, %s3257_s20 }
 0x232   : > { %863 = vrot.lane.b32.xlu1 %v518_v29, %s3866_s26 }
 0x236   : > { %861 = vrot.lane.b32.xlu1 %v518_v29, %s3861_s28 }
 0x23a   : > { %1035 = vrot.lane.b32.xlu1 %v518_v29, %s3864_s29 }
 0x23e   : > { %1033 = vrot.lane.b32.xlu1 %v518_v29, %s3857_s15 }
 0x29c   : > { %v525_v31 = vpop.permute.xlu1 %524  ;;  %v689_v33 = vpop.permute.xlu0 %688 }
 0x29d   : > { %2843 = vmatpush3.xpose.msk.msra.mxu0 %vm526_vm2, %v525_v31  ;;  %v1209_v31 = vld [vmem:[%s3848_s4 + $0x18] sm:$0xff] }
 0x29e   : > { %2852 = vmatprep.subr.mxu0 %v3253_v14 }
 0x2a0   : > { %2845 = vmatmul.mubr.msk.f32.vlgmr.msra.gmra.mrb[2].mxu0 %vm526_vm2, %v518_v29  ;;  %v691_v32 = vpop.permute.xlu1 %690  ;;  %v3029_v29 = vpack.c.bf16 %v1207_v28, %v1206_v27  ;;  %v2698_v27 = vld [vmem:[%s3853_s9] ss:$0 sm:$0xff] }
 0x2a1   : > { %2853 = vmatpush3.xpose.msk.msra.mxu0 %vm526_vm2, %v691_v32  ;;  %2854 = vmatprep.mubr.msk.f32.mxu0 %vm3254_vm1, %v3253_v14  ;;  %v3262_v32 = vmov 0.0|0.0  }
 0x2a2   : > { %2862 = vmatprep.subr.mxu0 %v3253_v14 }
 0x2a4   : > { %2855 = vmatmul.mubr.msk.f32.vlgmr.msra.gmra.mrb[4].mxu0 %vm526_vm2, %v689_v33  ;;  %v864_v34 = vpop.permute.xlu1 %863 }
 0x2a5   : > { %2863 = vmatpush3.xpose.msk.msra.mxu0 %vm526_vm2, %v864_v34  ;;  %2864 = vmatprep.mubr.msk.f32.mxu0 %vm3254_vm1, %v3253_v14 }
 0x2a6   : > { %2872 = vmatprep.subr.mxu0 %v3253_v14 }
 0x2a8   : > { %v862_v35 = vpop.permute.xlu1 %861 }
 0x2a9   : > { %2865 = vmatmul.mubr.msk.f32.vlgmr.msra.gmra.mrb[6].mxu0 %vm526_vm2, %v862_v35 }
 0x2aa   : > { %2874 = vmatprep.mubr.msk.f32.mxu0 %vm3254_vm1, %v3253_v14 }
 0x2ac   : > { %v1036_v36 = vpop.permute.xlu1 %1035 }
 0x2ad   : > { %2873 = vmatpush3.xpose.msk.msra.mxu0 %vm526_vm2, %v1036_v36 }
 0x2ae   : > { %3028 = vmatprep.subr.bf16.mxu0 %v3262_v32 }
 0x2b0   : > { %v1034_v37 = vpop.permute.xlu1 %1033 }
 0x2b1   : > { %2875 = vmatmul.mubr.msk.f32.vlgmr.msra.gmra.mrb[8].mxu0 %vm526_vm2, %v1034_v37  ;;  %v1210_v37 = vld [vmem:[%s3848_s4 + $0x20] sm:$0xff] }
 0x2b2   : > { %2898 = vmatprep.mubr.msk.f32.mxu0 %vm3254_vm1, %v3253_v14  ;;  %3030 = vmatpush3.bf16.msra.mxu0 %v3029_v29 }
 0x2b3   : > { %3031 = vmatprep.subr.bf16.mxu0 %v3262_v32 }
 0x373   : > { %v597_v38 = vpop.f32.mrb[2].mxu0 }
 0x374   : > { %v601_v39 = vmul.f32 0.25, %v597_v38  ;;  %v2846_v40 = vpop.f32.mrb[3].mxu0  ;;  %v1211_v38 = vld [vmem:[%s3848_s4 + $0x28] sm:$0xff] }
 0x375   : > { %v3035_v40 = vpack.c.bf16 %v1211_v38, %v1210_v37  ;;  %v2700_v37 = vld [vmem:[%s3855_s11] ss:$0 sm:$0xff] }
 0x376   : > { %v603_v41 = vsel %vm602_vm3, %v601_v39, -inf }
 0x377   : > { %604 = vmax.xlane.f32.xlu1 %v603_v41  ;;  %v762_v42 = vpop.f32.mrb[4].mxu0  ;;  %v1212_v41 = vld [vmem:[%s3848_s4 + $0x30] sm:$0xff] }
 0x378   : > { %v766_v43 = vmul.f32 0.25, %v762_v42  ;;  %v2856_v44 = vpop.f32.mrb[5].mxu0  ;;  %v1213_v42 = vld [vmem:[%s3848_s4 + $0x38] sm:$0xff] }
 0x37a   : > { %v767_v45 = vsel %vm602_vm3, %v766_v43, -inf }
 0x37b   : > { %768 = vmax.xlane.f32.xlu0 %v767_v45 }
 0x37c   : > { %v935_v46 = vpop.f32.mrb[6].mxu0 }
 0x37d   : > { %v939_v47 = vmul.f32 0.25, %v935_v46  ;;  %v2866_v48 = vpop.f32.mrb[7].mxu0 }
 0x37f   : > { %v940_v49 = vsel %vm602_vm3, %v939_v47, -inf }
 0x380   : > { %941 = vmax.xlane.f32.xlu1 %v940_v49 }
 0x384   : > { %v1107_v50 = vpop.f32.mrb[8].mxu0 }
 0x385   : > { %v1111_v51 = vmul.f32 0.25, %v1107_v50  ;;  %v2876_v52 = vpop.f32.mrb[9].mxu0 }
 0x386   : > { %v2694_v52 = vld [vmem:[%s3849_s5] ss:$0 sm:$0xff] }
 0x387   : > { %v1112_v53 = vsel %vm602_vm3, %v1111_v51, -inf }
 0x388   : > { %1113 = vmax.xlane.f32.xlu0 %v1112_v53 }
 0x391   : > { %779 = vrot.lane.b32.xlu1 %v3428_v30, %s3859_s18 }
 0x404   : > { %v605_v54 = vpop.xlane.xlu1 %604 }
 0x405   : > { %v606_v55 = vsub.f32 %v601_v39, %v605_v54 }
 0x407   : > { %v607_v56 = vmul.f32 1.442695, %v606_v55 }
 0x408   : > { %v769_v57 = vpop.xlane.xlu0 %768 }
 0x409   : > { %3147 = vpow2.f32 %v607_v56  ;;  %v770_v58 = vsub.f32 %v766_v43, %v769_v57  ;;  %v3038_v43 = vpack.c.bf16 %v1213_v42, %v1212_v41 }
 0x40b   : > { %v771_v59 = vmul.f32 1.442695, %v770_v58 }
 0x40d   : > { %3149 = vpow2.f32 %v771_v59  ;;  %v942_v60 = vpop.xlane.xlu1 %941 }
 0x40e   : > { %v943_v61 = vsub.f32 %v939_v47, %v942_v60 }
 0x410   : > { %v944_v62 = vmul.f32 1.442695, %v943_v61 }
 0x411   : > { %v780_v11 = vpop.permute.xlu1 %779 }
 0x412   : > { %3151 = vpow2.f32 %v944_v62 }
 0x413   : > { %v3148_v63 = vpop.eup %3147 }
 0x414   : > { %v609_v1 = vsel %vm602_vm3, %v3148_v63, 0.0 }
 0x415   : > { %610 = vadd.xlane.f32.xlu1 %v609_v1  ;;  %v1114_v2 = vpop.xlane.xlu0 %1113 }
 0x416   : > { %v1115_v3 = vsub.f32 %v1111_v51, %v1114_v2  ;;  %v1327_v2 = vld [vmem:[%s3852_s8 + $0x10] sm:$0xff] }
 0x417   : > { %v3150_v4 = vpop.eup %3149 }
 0x418   : > { %v1116_v5 = vmul.f32 1.442695, %v1115_v3  ;;  %v773_v6 = vsel %vm602_vm3, %v3150_v4, 0.0  ;;  %v1328_v3 = vld [vmem:[%s3852_s8 + $0x18] sm:$0xff] }
 0x419   : > { %774 = vadd.xlane.f32.xlu0 %v773_v6 }
 0x41a   : > { %3153 = vpow2.f32 %v1116_v5 }
 0x41c   : > { %v3152_v7 = vpop.eup %3151 }
 0x41d   : > { %v946_v8 = vsel %vm602_vm3, %v3152_v7, 0.0 }
 0x41e   : > { %947 = vadd.xlane.f32.xlu1 %v946_v8 }
 0x424   : > { %v3154_v9 = vpop.eup %3153 }
 0x425   : > { %v1118_v10 = vsel %vm602_vm3, %v3154_v9, 0.0 }
 0x426   : > { %1119 = vadd.xlane.f32.xlu0 %v1118_v10 }
 0x42f   : > { %1123 = vrot.lane.b32.xlu1 %v3428_v30, %s3857_s15  ;;  %s3874_s15 = smov 96  }
 0x43c   : > { %951 = vrot.lane.b32.xlu0 %v3428_v30, %s3861_s28  ;;  %v1208_v30 = vld [vmem:[%s3848_s4 + $0x10] sm:$0xff]  ;;  %s3873_s28 = smov 64  }
 0x43d   : > { %v3032_v33 = vpack.c.bf16 %v1209_v31, %v1208_v30 }
 0x43f   : > { %3033 = vmatpush3.bf16.msra.mxu0 %v3032_v33 }
 0x440   : > { %3034 = vmatprep.subr.bf16.mxu0 %v3262_v32 }
 0x443   : > { %3036 = vmatpush3.bf16.msra.mxu0 %v3035_v40 }
 0x444   : > { %3037 = vmatprep.subr.bf16.mxu0 %v3262_v32 }
 0x447   : > { %3039 = vmatpush3.bf16.msra.mxu0 %v3038_v43 }
 0x4a2   : > { %v611_v12 = vpop.xlane.xlu1 %610 }
 0x4a3   : > { %3155 = vrcp.f32 %v611_v12 }
 0x4a6   : > { %v775_v13 = vpop.xlane.xlu0 %774 }
 0x4a7   : > { %3157 = vrcp.f32 %v775_v13 }
 0x4ab   : > { %v948_v15 = vpop.xlane.xlu1 %947 }
 0x4ac   : > { %3159 = vrcp.f32 %v948_v15  ;;  %v1414_v15 = vld [vmem:[%s3854_s10] sm:$0xff] }
 0x4ad   : > { %v3156_v16 = vpop.eup %3155 }
 0x4ae   : > { %v613_v17 = vmul.f32 %v3156_v16, %v3148_v63  ;;  %v1325_v63 = vld [vmem:[%s3852_s8] sm:$0xff]  ;;  %v1415_v16 = vld [vmem:[%s3854_s10 + $0x8] sm:$0xff] }
 0x4af   : > { %v1124_v24 = vpop.permute.xlu1 %1123 }
 0x4b0   : > { %2850 = vmatmul.mubr.msk.f32.vlgmr.msra.gmra.mrb[0].mxu1 %vm602_vm3, %v613_v17  ;;  %v3047_v17 = vpack.c.bf16 %v1415_v16, %v1414_v15 }
 0x4b1   : > { %v3158_v18 = vpop.eup %3157  ;;  %2858 = vmatpush3.msra.mxu1 %v780_v11  ;;  %2859 = vmatprep.mubr.msk.f32.mxu1 %vm3254_vm1, %v3253_v14  ;;  %v2697_v11 = vld [vmem:[%s3851_s7] ss:$0 sm:$0xff] }
 0x4b2   : > { %v777_v19 = vmul.f32 %v3158_v18, %v3150_v4  ;;  %2867 = vmatprep.subr.mxu1 %v3253_v14  ;;  %v3044_v4 = vpack.c.bf16 %v1328_v3, %v1327_v2  ;;  %v1416_v18 = vld [vmem:[%s3854_s10 + $0x10] sm:$0xff]  ;;  %v2705_v2 = vld [vmem:[%s3846_s2 + $0x1] ss:$0 sm:$0xff] }
 0x4b3   : > { %v1120_v20 = vpop.xlane.xlu0 %1119 }
 0x4b4   : > { %3161 = vrcp.f32 %v1120_v20  ;;  %2860 = vmatmul.mubr.msk.f32.vlgmr.msra.gmra.mrb[2].mxu1 %vm602_vm3, %v777_v19  ;;  %v1417_v19 = vld [vmem:[%s3854_s10 + $0x18] sm:$0xff] }
 0x4b5   : > { %2869 = vmatprep.mubr.msk.f32.mxu1 %vm3254_vm1, %v3253_v14  ;;  %v3050_v20 = vpack.c.bf16 %v1417_v19, %v1416_v18 }
 0x4b6   : > { %v3160_v21 = vpop.eup %3159 }
 0x4b7   : > { %v950_v22 = vmul.f32 %v3160_v21, %v3152_v7  ;;  %v952_v23 = vpop.permute.xlu0 %951  ;;  %v1418_v21 = vld [vmem:[%s3854_s10 + $0x20] sm:$0xff] }
 0x4b8   : > { %2868 = vmatpush3.msra.mxu1 %v952_v23 }
 0x4b9   : > { %2870 = vmatmul.mubr.msk.f32.vlgmr.msra.gmra.mrb[4].mxu1 %vm602_vm3, %v950_v22  ;;  %2877 = vmatprep.subr.mxu1 %v3253_v14  ;;  %v1419_v22 = vld [vmem:[%s3854_s10 + $0x28] sm:$0xff] }
 0x4ba   : > { %2878 = vmatpush3.msra.mxu1 %v1124_v24  ;;  %2879 = vmatprep.mubr.msk.f32.mxu1 %vm3254_vm1, %v3253_v14  ;;  %v3053_v23 = vpack.c.bf16 %v1419_v22, %v1418_v21  ;;  %v1420_v24 = vld [vmem:[%s3854_s10 + $0x30] sm:$0xff] }
 0x4bb   : > { %3040 = vmatprep.subr.bf16.mxu1 %v3262_v32 }
 0x4be   : > { %v3162_v25 = vpop.eup %3161 }
 0x4bf   : > { %v1122_v26 = vmul.f32 %v3162_v25, %v3154_v9  ;;  %v2696_v9 = vld [vmem:[%s3850_s6] ss:$0 sm:$0xff]  ;;  %v1421_v25 = vld [vmem:[%s3854_s10 + $0x38] sm:$0xff] }
 0x4c1   : > { %2880 = vmatmul.mubr.msk.f32.vlgmr.msra.gmra.mrb[6].mxu1 %vm602_vm3, %v1122_v26  ;;  %v3056_v26 = vpack.c.bf16 %v1421_v25, %v1420_v24 }
 0x4c2   : > { %2909 = vmatprep.mubr.msk.f32.mxu1 %vm3254_vm1, %v3253_v14 }
 0x583   : > { %v683_v34 = vpop.f32.mrb[0].mxu1 }
 0x584   : > { %687 = vst.msk [vmem:[#allocation2] sm:$0xff] %vm526_vm2, %v683_v34  ;;  %v2851_v35 = vpop.f32.mrb[1].mxu1 }
 0x587   : > { %v851_v36 = vpop.f32.mrb[2].mxu1 }
 0x588   : > { %856 = vrot.lane.b32.xlu1 %v851_v36, %s3864_s29  ;;  %v2861_v39 = vpop.f32.mrb[3].mxu1 }
 0x58c   : > { %v1023_v44 = vpop.f32.mrb[4].mxu1 }
 0x58d   : > { %1028 = vrot.lane.b32.xlu0 %v1023_v44, %s3866_s26  ;;  %v2871_v45 = vpop.f32.mrb[5].mxu1  ;;  %s2761_s26 = sshll.u32 %s3350_s25, 7 }
 0x594   : > { %v1195_v46 = vpop.f32.mrb[6].mxu1 }
 0x595   : > { %1200 = vrot.lane.b32.xlu1 %v1195_v46, %s3257_s20  ;;  %v2881_v47 = vpop.f32.mrb[7].mxu1 }
 0x5fa   : > { %v857_v48 = vpop.permute.xlu1 %856 }
 0x5fb   : > { %860 = vst.msk [vmem:[#allocation2] sm:$0xff] %vm859_vm4, %v857_v48  ;;  %v2707_v48 = vld [vmem:[%s3847_s3 + $0x48] sm:$0xff] }
 0x5ff   : > { %v1029_v49 = vpop.permute.xlu0 %1028 }
 0x600   : > { %1032 = vst.msk [vmem:[#allocation2] sm:$0xff] %vm1031_vm5, %v1029_v49  ;;  %v2709_v49 = vld [vmem:[%s3847_s3 + $0x58] sm:$0xff] }
 0x607   : > { %v1201_v50 = vpop.permute.xlu1 %1200 }
 0x608   : > { %1204 = vst.msk [vmem:[#allocation2] sm:$0xff] %vm1203_vm6, %v1201_v50  ;;  %v3058_v50 = vpack.c.bf16 %v2709_v49, %v2707_v48 }
 0x60a   : > { %3059 = vmatprep.subr.bf16.mxu0 %v3058_v50 }
 0x60f   : > { %v1205_v51 = vld [vmem:[#allocation2] sm:$0xff] }
 0x610   : > { %2899 = vmatmul.mubr.msk.f32.vlgmr.msra.gmra.mrb[10].mxu0 %vm1221_vm7, %v1205_v51  ;;  %v2706_v51 = vld [vmem:[%s3847_s3 + $0x40] sm:$0xff] }
 0x611   : > { %1610 = vmatprep.mubr.f32.mxu0 %v3253_v14 }
 0x6e3   : > { %v1291_v53 = vpop.f32.mrb[10].mxu0 }
 0x6e4   : > { %v1292_v54 = vadd.f32 %v2694_v52, %v1291_v53  ;;  %v2900_v55 = vpop.f32.mrb[11].mxu0  ;;  %v2708_v52 = vld [vmem:[%s3847_s3 + $0x50] sm:$0xff] }
 0x6e5   : > { %v3060_v53 = vpack.c.bf16 %v2708_v52, %v2706_v51  ;;  %v2713_v55 = vld [vmem:[%s3847_s3 + $0x78] sm:$0xff] }
 0x6e6   : > { %v3526_v56 = vadd.f32 %v1292_v54, %v3382_v0  ;;  %v1326_v0 = vld [vmem:[%s3852_s8 + $0x8] sm:$0xff] }
 0x6e7   : > { %v3041_v1 = vpack.c.bf16 %v1326_v0, %v1325_v63  ;;  %3061 = vmatpush1.bf16.msra.mxu0 %v3060_v53  ;;  %v2711_v54 = vld [vmem:[%s3847_s3 + $0x68] sm:$0xff]  ;;  %v2704_v0 = vld [vmem:[%s3845_s1 + $0x1] ss:$0 sm:$0xff] }
 0x6e8   : > { %v1298_v57 = vsel %vm412_vm0, %v3526_v56, 0.0 }
 0x6e9   : > { %1299 = vadd.xlane.f32.xlu0 %v1298_v57  ;;  %3042 = vmatpush3.bf16.msra.mxu1 %v3041_v1  ;;  %v3062_v57 = vpack.c.bf16 %v2713_v55, %v2711_v54 }
 0x6ea   : > { %3043 = vmatprep.subr.bf16.mxu1 %v3262_v32 }
 0x6eb   : > { %3063 = vmatprep.subr.bf16.mxu0 %v3062_v57 }
 0x6ed   : > { %3045 = vmatpush3.bf16.msra.mxu1 %v3044_v4 }
 0x6ee   : > { %3046 = vmatprep.subr.bf16.mxu1 %v3262_v32 }
 0x776   : > { %v1300_v58 = vpop.xlane.xlu0 %1299 }
 0x777   : > { %v1301_v59 = vmul.f32 0.03125, %v1300_v58  ;;  %v2712_v58 = vld [vmem:[%s3847_s3 + $0x70] sm:$0xff] }
 0x779   : > { %v1302_v60 = vsub.f32 %v3526_v56, %v1301_v59 }
 0x77b   : > { %v1303_v61 = vmul.f32 %v1302_v60, %v1302_v60 }
 0x77d   : > { %v1304_v62 = vsel %vm412_vm0, %v1303_v61, 0.0 }
 0x77e   : > { %1305 = vadd.xlane.f32.xlu1 %v1304_v62 }
 0x80b   : > { %v1306_v5 = vpop.xlane.xlu1 %1305 }
 0x80c   : > { %v1307_v6 = vmul.f32 0.03125, %v1306_v5 }
 0x80e   : > { %v1308_v7 = vadd.f32 1e-05, %v1307_v6 }
 0x810   : > { %3163 = vrsqrt.f32 %v1308_v7 }
 0x81a   : > { %v3164_v8 = vpop.eup %3163 }
 0x81b   : > { %v1310_v10 = vmul.f32 %v3164_v8, %v1302_v60 }
 0x81d   : > { %v1317_v12 = vmul.f32 %v2696_v9, %v1310_v10 }
 0x81f   : > { %v1324_v13 = vadd.f32 %v2697_v11, %v1317_v12 }
 0x821   : > { %2910 = vmatmul.mubr.msk.f32.vlgmr.msra.gmra.mrb[8].mxu1 %vm412_vm0, %v1324_v13 }
 0x822   : > { %2928 = vmatprep.mubr.msk.f32.mxu1 %vm3254_vm1, %v3253_v14  ;;  %3048 = vmatpush3.bf16.msra.mxu1 %v3047_v17 }
 0x823   : > { %3049 = vmatprep.subr.bf16.mxu1 %v3262_v32 }
 0x826   : > { %3051 = vmatpush3.bf16.msra.mxu1 %v3050_v20 }
 0x827   : > { %3052 = vmatprep.subr.bf16.mxu1 %v3262_v32 }
 0x82a   : > { %3054 = vmatpush3.bf16.msra.mxu1 %v3053_v23 }
 0x82b   : > { %3055 = vmatprep.subr.bf16.mxu1 %v3262_v32 }
 0x82e   : > { %3057 = vmatpush3.bf16.msra.mxu1 %v3056_v26 }
 0x82f   : > { %2936 = vmatprep.subr.mxu1 %v3253_v14 }
 0x8f4   : > { %v1405_v28 = vpop.f32.mrb[8].mxu1 }
 0x8f5   : > { %v1406_v29 = vadd.f32 %v2698_v27, %v1405_v28  ;;  %v2911_v30 = vpop.f32.mrb[9].mxu1 }
 0x8f7   : > { %v1410_v31 = vmul.f32 0.70710677, %v1406_v29  ;;  %v1409_v34 = vmul.f32 0.5, %v1406_v29 }
 0x8f9   : > { %3165 = verf.f32 %v1410_v31 }
 0x903   : > { %v3166_v33 = vpop.eup %3165 }
 0x904   : > { %v1412_v35 = vadd.f32 1.0, %v3166_v33 }
 0x906   : > { %v1413_v36 = vmul.f32 %v1412_v35, %v1409_v34 }
 0x908   : > { %2929 = vmatmul.mubr.msk.f32.vlgmr.msra.gmra.mrb[10].mxu1 %vm1221_vm7, %v1413_v36 }
 0x909   : > { %2938 = vmatprep.mubr.msk.f32.mxu1 %vm3254_vm1, %v3253_v14 }
 0x9db   : > { %v1498_v38 = vpop.f32.mrb[10].mxu1 }
 0x9dc   : > { %v1499_v39 = vadd.f32 %v2700_v37, %v1498_v38  ;;  %v2930_v40 = vpop.f32.mrb[11].mxu1 }
 0x9de   : > { %v3593_v41 = vadd.f32 %v1499_v39, %v3526_v56  ;;  %v2710_v56 = vld [vmem:[%s3847_s3 + $0x60] sm:$0xff] }
 0x9df   : > { %v3064_v59 = vpack.c.bf16 %v2712_v58, %v2710_v56 }
 0x9e0   : > { %v1507_v42 = vsel %vm412_vm0, %v3593_v41, 0.0 }
 0x9e1   : > { %1508 = vadd.xlane.f32.xlu0 %v1507_v42  ;;  %3065 = vmatpush1.bf16.msra.mxu0 %v3064_v59 }
 0x9e2   : > { %2931 = vmatprep.subr.mxu0 %v3253_v14 }
 0xa6e   : > { %v1509_v43 = vpop.xlane.xlu0 %1508 }
 0xa6f   : > { %v1510_v44 = vmul.f32 0.03125, %v1509_v43 }
 0xa71   : > { %v1511_v45 = vsub.f32 %v3593_v41, %v1510_v44 }
 0xa73   : > { %v1512_v46 = vmul.f32 %v1511_v45, %v1511_v45 }
 0xa75   : > { %v1513_v47 = vsel %vm412_vm0, %v1512_v46, 0.0 }
 0xa76   : > { %1514 = vadd.xlane.f32.xlu0 %v1513_v47 }
 0xb03   : > { %v1515_v60 = vpop.xlane.xlu0 %1514 }
 0xb04   : > { %v1516_v61 = vmul.f32 0.03125, %v1515_v60 }
 0xb06   : > { %v1517_v62 = vadd.f32 1e-05, %v1516_v61 }
 0xb08   : > { %3167 = vrsqrt.f32 %v1517_v62 }
 0xb12   : > { %v3168_v63 = vpop.eup %3167 }
 0xb13   : > { %v1519_v1 = vmul.f32 %v3168_v63, %v1511_v45 }
 0xb15   : > { %v1526_v3 = vmul.f32 %v2704_v0, %v1519_v1 }
 0xb17   : > { %v1533_v4 = vadd.f32 %v2705_v2, %v1526_v3 }
 0xb19   : > { %2714 = vmatmul.mubr.msk.f32.vlgmr.msra.gmra.mrb[12].mxu0 %vm412_vm0, %v1533_v4  ;;  %v2727_v4 = vld [vmem:[%s3848_s4 + $0x40] sm:$0xff] }
 0xb1a   : > { %2933 = vmatprep.mubr.msk.f32.mxu0 %vm3254_vm1, %v3253_v14 }
 0xbec   : > { %v1612_v5 = vpop.f32.mrb[12].mxu0 }
 0xbed   : > { %1782 = vrot.lane.b32.xlu0 %v1612_v5, %s3257_s20  ;;  %1618 = vrot.lane.b32.xlu1 %v1612_v5, %s3873_s28  ;;  %v3635_v6 = vpop.f32.mrb[13].mxu0 }
 0xbee   : > { %2937 = vmatpush3.msra.mxu1 %v3635_v6 }
 0xbef   : > { %2946 = vmatprep.subr.mxu1 %v3253_v14 }
 0xbf1   : > { %1952 = vrot.lane.b32.xlu0 %v1612_v5, %s3874_s15  ;;  %1780 = vrot.lane.b32.xlu1 %v1612_v5, %s3875_s0 }
 0xbf5   : > { %2123 = vrot.lane.b32.xlu0 %v1612_v5, %s3876_s30  ;;  %1954 = vrot.lane.b32.xlu1 %v1612_v5, %s3877_s16 }
 0xbf9   : > { %2125 = vrot.lane.b32.xlu1 %v1612_v5, %s3878_s17 }
 0xc5f   : > { %v1619_v7 = vpop.permute.xlu1 %1618  ;;  %v1783_v8 = vpop.permute.xlu0 %1782 }
 0xc60   : > { %2932 = vmatpush3.xpose.msk.msra.mxu0 %vm526_vm2, %v1619_v7 }
 0xc61   : > { %2941 = vmatprep.subr.mxu0 %v3253_v14 }
 0xc63   : > { %2934 = vmatmul.mubr.msk.f32.vlgmr.msra.gmra.mrb[14].mxu0 %vm526_vm2, %v1612_v5  ;;  %v1781_v9 = vpop.permute.xlu1 %1780  ;;  %v1953_v11 = vpop.permute.xlu0 %1952  ;;  %v2728_v5 = vld [vmem:[%s3848_s4 + $0x48] sm:$0xff] }
 0xc64   : > { %2942 = vmatpush3.xpose.msk.msra.mxu0 %vm526_vm2, %v1783_v8  ;;  %2943 = vmatprep.mubr.msk.f32.mxu0 %vm3254_vm1, %v3253_v14  ;;  %v3067_v7 = vpack.c.bf16 %v2728_v5, %v2727_v4  ;;  %v2730_v8 = vld [vmem:[%s3848_s4 + $0x58] sm:$0xff] }
 0xc65   : > { %2951 = vmatprep.subr.mxu0 %v3253_v14 }
 0xc67   : > { %2944 = vmatmul.mubr.msk.f32.vlgmr.msra.gmra.mrb[16].mxu0 %vm526_vm2, %v1781_v9  ;;  %v1955_v10 = vpop.permute.xlu1 %1954  ;;  %v2124_v13 = vpop.permute.xlu0 %2123 }
 0xc68   : > { %2952 = vmatpush3.xpose.msk.msra.mxu0 %vm526_vm2, %v1955_v10  ;;  %2953 = vmatprep.mubr.msk.f32.mxu0 %vm3254_vm1, %v3253_v14 }
 0xc69   : > { %2961 = vmatprep.subr.mxu0 %v3253_v14 }
 0xc6b   : > { %2954 = vmatmul.mubr.msk.f32.vlgmr.msra.gmra.mrb[18].mxu0 %vm526_vm2, %v1953_v11  ;;  %v2126_v12 = vpop.permute.xlu1 %2125 }
 0xc6c   : > { %2962 = vmatpush3.xpose.msk.msra.mxu0 %vm526_vm2, %v2126_v12  ;;  %2963 = vmatprep.mubr.msk.f32.mxu0 %vm3254_vm1, %v3253_v14 }
 0xc6d   : > { %3066 = vmatprep.subr.bf16.mxu0 %v3262_v32 }
 0xc6f   : > { %2964 = vmatmul.mubr.msk.f32.vlgmr.msra.gmra.mrb[20].mxu0 %vm526_vm2, %v2124_v13 }
 0xc70   : > { %2987 = vmatprep.mubr.msk.f32.mxu0 %vm3254_vm1, %v3253_v14  ;;  %3068 = vmatpush3.bf16.msra.mxu0 %v3067_v7 }
 0xc71   : > { %3069 = vmatprep.subr.bf16.mxu0 %v3262_v32 }
 0xd36   : > { %v1690_v15 = vpop.f32.mrb[14].mxu0 }
 0xd37   : > { %v1694_v16 = vmul.f32 0.25, %v1690_v15  ;;  %v2935_v17 = vpop.f32.mrb[15].mxu0 }
 0xd38   : > { %v2731_v17 = vld [vmem:[%s3848_s4 + $0x60] sm:$0xff] }
 0xd39   : > { %v1695_v18 = vsel %vm602_vm3, %v1694_v16, -inf }
 0xd3a   : > { %1696 = vmax.xlane.f32.xlu1 %v1695_v18  ;;  %v1854_v19 = vpop.f32.mrb[16].mxu0  ;;  %v2732_v18 = vld [vmem:[%s3848_s4 + $0x68] sm:$0xff] }
 0xd3b   : > { %v1858_v20 = vmul.f32 0.25, %v1854_v19  ;;  %v2945_v21 = vpop.f32.mrb[17].mxu0  ;;  %v3073_v19 = vpack.c.bf16 %v2732_v18, %v2731_v17 }
 0xd3c   : > { %v2734_v21 = vld [vmem:[%s3848_s4 + $0x78] sm:$0xff] }
 0xd3d   : > { %v1859_v22 = vsel %vm602_vm3, %v1858_v20, -inf }
 0xd3e   : > { %1860 = vmax.xlane.f32.xlu0 %v1859_v22  ;;  %v2026_v23 = vpop.f32.mrb[18].mxu0 }
 0xd3f   : > { %v2030_v24 = vmul.f32 0.25, %v2026_v23  ;;  %v2955_v25 = vpop.f32.mrb[19].mxu0 }
 0xd41   : > { %v2031_v26 = vsel %vm602_vm3, %v2030_v24, -inf }
 0xd42   : > { %2032 = vmax.xlane.f32.xlu0 %v2031_v26  ;;  %v2197_v27 = vpop.f32.mrb[20].mxu0 }
 0xd43   : > { %v2201_v28 = vmul.f32 0.25, %v2197_v27  ;;  %v2965_v29 = vpop.f32.mrb[21].mxu0 }
 0xd44   : > { %v2736_v29 = vld [vmem:[%s3849_s5 + $0x1] ss:$0 sm:$0xff] }
 0xd45   : > { %v2202_v30 = vsel %vm602_vm3, %v2201_v28, -inf }
 0xd46   : > { %2203 = vmax.xlane.f32.xlu1 %v2202_v30 }
 0xdc7   : > { %v1697_v31 = vpop.xlane.xlu1 %1696 }
 0xdc8   : > { %v1698_v33 = vsub.f32 %v1694_v16, %v1697_v31 }
 0xdca   : > { %v1699_v34 = vmul.f32 1.442695, %v1698_v33 }
 0xdcb   : > { %v1861_v35 = vpop.xlane.xlu0 %1860 }
 0xdcc   : > { %3169 = vpow2.f32 %v1699_v34  ;;  %v1862_v36 = vsub.f32 %v1858_v20, %v1861_v35  ;;  %v2733_v20 = vld [vmem:[%s3848_s4 + $0x70] sm:$0xff] }
 0xdcd   : > { %v3076_v22 = vpack.c.bf16 %v2734_v21, %v2733_v20 }
 0xdce   : > { %v1863_v37 = vmul.f32 1.442695, %v1862_v36 }
 0xdcf   : > { %v2033_v38 = vpop.xlane.xlu0 %2032 }
 0xdd0   : > { %3171 = vpow2.f32 %v1863_v37  ;;  %v2034_v39 = vsub.f32 %v2030_v24, %v2033_v38 }
 0xdd2   : > { %v2035_v40 = vmul.f32 1.442695, %v2034_v39 }
 0xdd3   : > { %v2204_v48 = vpop.xlane.xlu1 %2203 }
 0xdd4   : > { %3173 = vpow2.f32 %v2035_v40  ;;  %v2205_v49 = vsub.f32 %v2201_v28, %v2204_v48 }
 0xdd6   : > { %v3170_v42 = vpop.eup %3169  ;;  %v2206_v50 = vmul.f32 1.442695, %v2205_v49 }
 0xdd7   : > { %v1701_v43 = vsel %vm602_vm3, %v3170_v42, 0.0 }
 0xdd8   : > { %1702 = vadd.xlane.f32.xlu0 %v1701_v43  ;;  %3175 = vpow2.f32 %v2206_v50 }
 0xdda   : > { %v3172_v44 = vpop.eup %3171 }
 0xddb   : > { %v1865_v45 = vsel %vm602_vm3, %v3172_v44, 0.0 }
 0xddc   : > { %1866 = vadd.xlane.f32.xlu1 %v1865_v45  ;;  %v2745_v45 = vld [vmem:[%s3852_s8 + $0x38] sm:$0xff] }
 0xdde   : > { %v3174_v46 = vpop.eup %3173 }
 0xddf   : > { %v2037_v47 = vsel %vm602_vm3, %v3174_v46, 0.0 }
 0xde0   : > { %2038 = vadd.xlane.f32.xlu0 %v2037_v47 }
 0xde2   : > { %v3176_v51 = vpop.eup %3175 }
 0xde3   : > { %v2208_v52 = vsel %vm602_vm3, %v3176_v51, 0.0 }
 0xded   : > { %2042 = vrot.lane.b32.xlu1 %v3635_v6, %s3874_s15  ;;  %s3801_s15 = scalar_lea.hbm %s3856_s12, %s2761_s26 }
 0xdf6   : > { %1871 = vrot.lane.b32.xlu0 %v3635_v6, %s3875_s0 }
 0xe11   : > { %2209 = vadd.xlane.f32.xlu1 %v2208_v52 }
 0xe22   : > { %2213 = vrot.lane.b32.xlu1 %v3635_v6, %s3876_s30  ;;  %v2729_v6 = vld [vmem:[%s3848_s4 + $0x50] sm:$0xff] }
 0xe23   : > { %v3070_v9 = vpack.c.bf16 %v2730_v8, %v2729_v6 }
 0xe25   : > { %3071 = vmatpush3.bf16.msra.mxu0 %v3070_v9 }
 0xe26   : > { %3072 = vmatprep.subr.bf16.mxu0 %v3262_v32 }
 0xe29   : > { %3074 = vmatpush3.bf16.msra.mxu0 %v3073_v19 }
 0xe2a   : > { %3075 = vmatprep.subr.bf16.mxu0 %v3262_v32 }
 0xe2d   : > { %3077 = vmatpush3.bf16.msra.mxu0 %v3076_v22 }
 0xe65   : > { %v1703_v53 = vpop.xlane.xlu0 %1702 }
 0xe66   : > { %3177 = vrcp.f32 %v1703_v53  ;;  %v2741_v53 = vld [vmem:[%s3851_s7 + $0x1] ss:$0 sm:$0xff] }
 0xe69   : > { %v1867_v54 = vpop.xlane.xlu1 %1866 }
 0xe6a   : > { %3179 = vrcp.f32 %v1867_v54 }
 0xe6d   : > { %v2039_v55 = vpop.xlane.xlu0 %2038  ;;  %v2043_v61 = vpop.permute.xlu1 %2042 }
 0xe6e   : > { %3181 = vrcp.f32 %v2039_v55 }
 0xe70   : > { %v3178_v56 = vpop.eup %3177 }
 0xe71   : > { %v1705_v57 = vmul.f32 %v3178_v56, %v3170_v42  ;;  %v1872_v58 = vpop.permute.xlu0 %1871  ;;  %v2742_v42 = vld [vmem:[%s3852_s8 + $0x20] sm:$0xff] }
 0xe72   : > { %v2749_v56 = vld [vmem:[%s3854_s10 + $0x40] sm:$0xff] }
 0xe73   : > { %2939 = vmatmul.mubr.msk.f32.vlgmr.msra.gmra.mrb[12].mxu1 %vm602_vm3, %v1705_v57  ;;  %v2750_v57 = vld [vmem:[%s3854_s10 + $0x48] sm:$0xff] }
 0xe74   : > { %v3180_v59 = vpop.eup %3179  ;;  %2947 = vmatpush3.msra.mxu1 %v1872_v58  ;;  %2948 = vmatprep.mubr.msk.f32.mxu1 %vm3254_vm1, %v3253_v14  ;;  %v3085_v58 = vpack.c.bf16 %v2750_v57, %v2749_v56 }
 0xe75   : > { %v1869_v60 = vmul.f32 %v3180_v59, %v3172_v44  ;;  %2956 = vmatprep.subr.mxu1 %v3253_v14  ;;  %v2744_v44 = vld [vmem:[%s3852_s8 + $0x30] sm:$0xff] }
 0xe76   : > { %v2751_v59 = vld [vmem:[%s3854_s10 + $0x50] sm:$0xff] }
 0xe77   : > { %2949 = vmatmul.mubr.msk.f32.vlgmr.msra.gmra.mrb[14].mxu1 %vm602_vm3, %v1869_v60 }
 0xe78   : > { %v3182_v62 = vpop.eup %3181  ;;  %2957 = vmatpush3.msra.mxu1 %v2043_v61  ;;  %2958 = vmatprep.mubr.msk.f32.mxu1 %vm3254_vm1, %v3253_v14  ;;  %v2753_v61 = vld [vmem:[%s3854_s10 + $0x60] sm:$0xff] }
 0xe79   : > { %v2041_v63 = vmul.f32 %v3182_v62, %v3174_v46  ;;  %2966 = vmatprep.subr.mxu1 %v3253_v14  ;;  %v3082_v46 = vpack.c.bf16 %v2745_v45, %v2744_v44  ;;  %v2754_v62 = vld [vmem:[%s3854_s10 + $0x68] sm:$0xff] }
 0xe7b   : > { %2959 = vmatmul.mubr.msk.f32.vlgmr.msra.gmra.mrb[16].mxu1 %vm602_vm3, %v2041_v63  ;;  %v3091_v63 = vpack.c.bf16 %v2754_v62, %v2753_v61 }
 0xe7c   : > { %2968 = vmatprep.mubr.msk.f32.mxu1 %vm3254_vm1, %v3253_v14 }
 0xe9e   : > { %v2210_v0 = vpop.xlane.xlu1 %2209 }
 0xe9f   : > { %3183 = vrcp.f32 %v2210_v0  ;;  %v2755_v0 = vld [vmem:[%s3854_s10 + $0x70] sm:$0xff] }
 0xea2   : > { %v2214_v1 = vpop.permute.xlu1 %2213 }
 0xea3   : > { %2967 = vmatpush3.msra.mxu1 %v2214_v1  ;;  %v2756_v1 = vld [vmem:[%s3854_s10 + $0x78] sm:$0xff] }
 0xea4   : > { %3078 = vmatprep.subr.bf16.mxu1 %v3262_v32 }
 0xea9   : > { %v3184_v2 = vpop.eup %3183 }
 0xeaa   : > { %v2212_v3 = vmul.f32 %v3184_v2, %v3176_v51  ;;  %v2740_v51 = vld [vmem:[%s3850_s6 + $0x1] ss:$0 sm:$0xff]  ;;  %v3094_v2 = vpack.c.bf16 %v2756_v1, %v2755_v0 }
 0xeac   : > { %2969 = vmatmul.mubr.msk.f32.vlgmr.msra.gmra.mrb[18].mxu1 %vm602_vm3, %v2212_v3  ;;  %v2747_v3 = vld [vmem:[%s3853_s9 + $0x1] ss:$0 sm:$0xff] }
 0xead   : > { %2998 = vmatprep.mubr.msk.f32.mxu1 %vm3254_vm1, %v3253_v14 }
 0xf46   : > { %v1775_v10 = vpop.f32.mrb[12].mxu1 }
 0xf47   : > { %1779 = vst.msk [vmem:[#allocation2] sm:$0xff] %vm526_vm2, %v1775_v10  ;;  %v2940_v11 = vpop.f32.mrb[13].mxu1 }
 0xf48   : > { %v2758_v11 = vld [vmem:[%s3855_s11 + $0x1] ss:$0 sm:$0xff] }
 0xf4a   : > { %v1943_v12 = vpop.f32.mrb[14].mxu1 }
 0xf4b   : > { %1948 = vrot.lane.b32.xlu0 %v1943_v12, %s3878_s17  ;;  %v2950_v13 = vpop.f32.mrb[15].mxu1  ;;  %s402_s17 = sand.u32 1, %s3243_s22  }
 0xf4c   : > { %s2601_s0 = scalar_lea.sflag [#allocation4], %s402_s17 }
 0xf4e   : > { %v2114_v15 = vpop.f32.mrb[16].mxu1 }
 0xf4f   : > { %2119 = vrot.lane.b32.xlu1 %v2114_v15, %s3877_s16  ;;  %v2960_v16 = vpop.f32.mrb[17].mxu1  ;;  %s2677_s16 = sshll.u32 %s402_s17, 3 }
 0xf50   : > { %s404_s29 = scalar_lea.vmem [#allocation3], %s2677_s16  ;;  %s3263_s16 = smov [#allocation3]  }
 0xf51   : > { %s2614_s18 = sshll.u32 %s404_s29, 4  ;;  %s3193_s30 = sshll.u32 %s3263_s16, 4  ;;  %s3803_s18 = int_to_ptr.vmem [resolvable:$true] %s2614_s18  ;;  %s3194_s30 = int_to_ptr.vmem [resolvable:$false] %s3193_s30 }
 0xf52   : > { %s3189_s25 = scalar_lea.vmem %s3803_s18, 128  ;;  %p3196_p0 = scmp.lt.s32.totalorder %s3803_s18, %s3194_s30 }
 0xf53   : > { %p3190_p11 = scmp.ne.s32.totalorder %s3803_s18, %s3189_s25 }
 0xf55   : > { %p3191_p12 = pnand %p3190_p11, %p3367_p5 }
 0xf57   : > { %p3192_p13 = pneg %p3191_p12 }
 0xf7f   : > { %v2285_v23 = vpop.f32.mrb[18].mxu1 }
 0xf80   : > { %2290 = vrot.lane.b32.xlu0 %v2285_v23, %s3257_s20  ;;  %v2970_v24 = vpop.f32.mrb[19].mxu1  ;;  %s3195_s20 = scalar_lea.vmem %s3194_s30, 256 }
 0xf81   : > { %p3197_p1 = scmp.lt.s32.totalorder %s3195_s20, %s3189_s25 }
 0xf83   : > { %p3198_p2 = por %p3197_p1, %p3196_p0 }
 0xf85   : > { %p3199_p3 = pnand %p3198_p2, %p3192_p13 }
 0xfbd   : > { %v1949_v25 = vpop.permute.xlu0 %1948 }
 0xfbe   : > { %1951 = vst.msk [vmem:[#allocation2] sm:$0xff] %vm859_vm4, %v1949_v25 }
 0xfc1   : > { %v2120_v26 = vpop.permute.xlu1 %2119 }
 0xfc2   : > { %2122 = vst.msk [vmem:[#allocation2] sm:$0xff] %vm1031_vm5, %v2120_v26 }
 0xff2   : > { %v2291_v27 = vpop.permute.xlu0 %2290 }
 0xff3   : > { %2293 = vst.msk [vmem:[#allocation2] sm:$0xff] %vm1203_vm6, %v2291_v27 }
 0xffa   : > { %v2294_v28 = vld [vmem:[#allocation2] sm:$0xff] }
 0xffb   : > { %2988 = vmatmul.mubr.msk.f32.vlgmr.msra.gmra.mrb[22].mxu0 %vm1221_vm7, %v2294_v28 }
0x10ce   : > { %v2381_v30 = vpop.f32.mrb[22].mxu0 }
0x10cf   : > { %v2382_v31 = vadd.f32 %v2736_v29, %v2381_v30  ;;  %v2989_v33 = vpop.f32.mrb[23].mxu0 }
0x10d1   : > { %v3732_v34 = vadd.f32 %v2382_v31, %v3593_v41  ;;  %v2743_v41 = vld [vmem:[%s3852_s8 + $0x28] sm:$0xff] }
0x10d2   : > { %v3079_v43 = vpack.c.bf16 %v2743_v41, %v2742_v42 }
0x10d3   : > { %v2390_v35 = vsel %vm412_vm0, %v3732_v34, 0.0 }
0x10d4   : > { %2391 = vadd.xlane.f32.xlu1 %v2390_v35  ;;  %3080 = vmatpush3.bf16.msra.mxu1 %v3079_v43 }
0x10d5   : > { %3081 = vmatprep.subr.bf16.mxu1 %v3262_v32 }
0x10d8   : > { %3083 = vmatpush3.bf16.msra.mxu1 %v3082_v46 }
0x10d9   : > { %3084 = vmatprep.subr.bf16.mxu1 %v3262_v32 }
0x1161   : > { %v2392_v36 = vpop.xlane.xlu1 %2391 }
0x1162   : > { %v2393_v37 = vmul.f32 0.03125, %v2392_v36 }
0x1164   : > { %v2394_v38 = vsub.f32 %v3732_v34, %v2393_v37 }
0x1166   : > { %v2395_v39 = vmul.f32 %v2394_v38, %v2394_v38 }
0x1168   : > { %v2396_v40 = vsel %vm412_vm0, %v2395_v39, 0.0 }
0x1169   : > { %2397 = vadd.xlane.f32.xlu0 %v2396_v40 }
0x11f6   : > { %v2398_v47 = vpop.xlane.xlu0 %2397 }
0x11f7   : > { %v2399_v48 = vmul.f32 0.03125, %v2398_v47 }
0x11f9   : > { %v2400_v49 = vadd.f32 1e-05, %v2399_v48 }
0x11fb   : > { %3185 = vrsqrt.f32 %v2400_v49 }
0x1205   : > { %v3186_v50 = vpop.eup %3185 }
0x1206   : > { %v2402_v52 = vmul.f32 %v3186_v50, %v2394_v38 }
0x1208   : > { %v2409_v54 = vmul.f32 %v2740_v51, %v2402_v52 }
0x120a   : > { %v2416_v55 = vadd.f32 %v2741_v53, %v2409_v54 }
0x120c   : > { %2999 = vmatmul.mubr.msk.f32.vlgmr.msra.gmra.mrb[20].mxu1 %vm412_vm0, %v2416_v55 }
0x120d   : > { %3017 = vmatprep.mubr.msk.f32.mxu1 %vm3254_vm1, %v3253_v14  ;;  %3086 = vmatpush3.bf16.msra.mxu1 %v3085_v58  ;;  %v2752_v14 = vld [vmem:[%s3854_s10 + $0x58] sm:$0xff] }
0x120e   : > { %3087 = vmatprep.subr.bf16.mxu1 %v3262_v32  ;;  %v3088_v60 = vpack.c.bf16 %v2752_v14, %v2751_v59 }
0x1211   : > { %3089 = vmatpush3.bf16.msra.mxu1 %v3088_v60 }
0x1212   : > { %3090 = vmatprep.subr.bf16.mxu1 %v3262_v32 }
0x1215   : > { %3092 = vmatpush3.bf16.msra.mxu1 %v3091_v63 }
0x1216   : > { %3093 = vmatprep.subr.bf16.mxu1 %v3262_v32 }
0x1219   : > { %3095 = vmatpush3.bf16.msra.mxu1 %v3094_v2 }
0x12df   : > { %v2499_v4 = vpop.f32.mrb[20].mxu1 }
0x12e0   : > { %v2500_v5 = vadd.f32 %v2747_v3, %v2499_v4  ;;  %v3000_v6 = vpop.f32.mrb[21].mxu1 }
0x12e2   : > { %v2504_v32 = vmul.f32 0.70710677, %v2500_v5  ;;  %v2503_v8 = vmul.f32 0.5, %v2500_v5 }
0x12e4   : > { %3187 = verf.f32 %v2504_v32 }
0x12ee   : > { %v3188_v7 = vpop.eup %3187 }
0x12ef   : > { %v2506_v9 = vadd.f32 1.0, %v3188_v7 }
0x12f1   : > { %v2507_v10 = vmul.f32 %v2506_v9, %v2503_v8 }
0x12f3   : > { %3018 = vmatmul.mubr.msk.f32.vlgmr.msra.gmra.mrb[22].mxu1 %vm1221_vm7, %v2507_v10 }
0x13c6   : > { %v2594_v12 = vpop.f32.mrb[22].mxu1 }
0x13c7   : > { %v2595_v13 = vadd.f32 %v2758_v11, %v2594_v12  ;;  %v3019_v15 = vpop.f32.mrb[23].mxu1 }
0x13c9   : > { %v2598_v16 = vadd.f32 %v2595_v13, %v3732_v34 }
0x13cb   : > { %2599 = vst.msk [vmem:[%s404_s29] sm:$0xff] %vm412_vm0, %v2598_v16 }
0x13cc   : > { %3202 = shalt.err (!%p3199_p3)
}
0x13cd   : > { %s3203_s17 = scalar_lea.hbm %s3801_s15, 128  ;;  %s3207_s19 = scalar_lea.hbm %s3856_s12, 256 }
0x13ce   : > { %p3204_p4 = scmp.ne.s32.totalorder %s3801_s15, %s3203_s17  ;;  %p3208_p9 = scmp.lt.u32.totalorder %s3801_s15, %s3856_s12 }
0x13cf   : > { %p3209_p10 = scmp.lt.u32.totalorder %s3207_s19, %s3203_s17  ;;  %p3211_p12 = scmp.lt.u32.totalorder %s3203_s17, %s3801_s15 }
0x13d0   : > { %p3205_p7 = pnand %p3204_p4, %p3367_p5 }
0x13d1   : > { %p3210_p11 = por %p3209_p10, %p3208_p9 }
0x13d2   : > { %p3206_p8 = pneg %p3205_p7 }
0x13d3   : > { %p3212_p13 = por %p3211_p12, %p3210_p11 }
0x13d5   : > { %p3213_p0 = pnand %p3212_p13, %p3206_p8 }
0x13d7   : > { %3216 = shalt.err (!%p3213_p0)
}
0x13d8   : > { %3096 = dma.vmem_to_hbm [thread:$0]  (%p3367_p5), %s3803_s18, 128, %s3801_s15, %s2601_s0  }
0x13d9 PF: > { %p3102_p1 = scmp.ge.s32.totalorder %s3251_s24, 2  ;;  %s2626_s25 = sand.u32 1, %s3239_s21  }
0x13da   : > { %s2627_s30 = scalar_lea.sflag [#allocation4], %s2626_s25 }
0x13db   : > { %p3099_p2 = pnand %p3102_p1, %p3371_p6 }
0x13dd   : > { %3234 = dma.done.wait (!%p3099_p2), %s2627_s30, 128  }
0x13de   : > { %3236 = vsyncadd (!%p3099_p2), %s2627_s30, 4294967168  ;;  %s3879_s20 = sld [smem:[#allocation6_spill]]  ;;  %p22_p3 = scmp.ge.s32.totalorder %s3354_s27, 4  }
0x13df   : > { %s3880_s21 = smov %s3243_s22  ;;  %s3881_s22 = smov %s3247_s23 }
0x13e0   : > { %s3883_s24 = smov %s3354_s27  ;;  %24 = sbr.rel (!%p22_p3) target bundleno = 5 (0x5), region = 114 }
0x13e4   : > { %s3882_s23 = smov %s3879_s20 }
0x13e7   :  { %2632 = vsyncpa [#allocation4], 1 }
0x13e8   :  { %2634 = vsyncpa [#allocation4 + $0x1], 1 }

</bundles_post_ra>
